<compile_context>
chip_gen: v5e
topology: v5e:2x2
jax: 0.10.0
libtpu: 0.0.40
codegen_flags: <defaults>
</compile_context>

<pallas_src>
import functools

import jax
import jax.numpy as jnp
from jax.experimental import pallas as pl
from jax.experimental.pallas import tpu as pltpu


def _mam_kernel(x_ref, w1t_ref, b1_ref, w3t_ref, o_ref, *, num_segments, c0, c1):
    """x_ref / o_ref block: (1, T, C, hw_tile); weights are small full arrays."""
    w1t = w1t_ref[...]                        # (Cs, C)  BN-folded conv1, transposed
    w3t = w3t_ref[...]                        # (C, Cs)  conv3, transposed
    cs = w1t_ref.shape[0]
    hw_tile = x_ref.shape[3]
    # Hoisted broadcast of the folded-BN bias (added after the temporal mix;
    # exact since the mix weights sum to 1).
    b1 = jnp.broadcast_to(b1_ref[...], (cs, hw_tile)).astype(jnp.float32)

    def conv1(t):
        # Per-tile cast in vregs (no extra HBM pass); (Cs,C) @ (C,hw) on the MXU
        # with f32 accumulation.
        x_t = x_ref[0, t, :, :].astype(w1t.dtype)
        return jnp.dot(w1t, x_t, preferred_element_type=jnp.float32)

    def conv3_store(t, a_t):
        a_t = (a_t + b1).astype(w3t.dtype)
        # (C, Cs) @ (Cs, hw_tile) -> (C, hw_tile): lane-dense store into NCHW out.
        y_t = jnp.dot(w3t, a_t, preferred_element_type=jnp.float32)
        o_ref[0, t, :, :] = y_t.astype(o_ref.dtype)

    # Temporal mix: a[t] = c0*z[t] + c1*z[t+1]  (c0 + c1 == 1),  a[T-1] = z[T-1].
    # T is small & static; fully unrolled, one frame of y live at a time.
    z_prev = conv1(0)
    for t in range(num_segments - 1):
        z_next = conv1(t + 1)
        conv3_store(t, c0 * z_prev + c1 * z_next)
        z_prev = z_next
    conv3_store(num_segments - 1, z_prev)


def _vmem_capacity_bytes():
    """Physical VMEM of the local chip; conservative fallback if unavailable."""
    try:
        info = pltpu.get_tpu_info()
        cap = getattr(info, "vmem_capacity_bytes", None)
        if cap:
            return int(cap)
    except Exception:
        pass
    return 64 * 1024 * 1024      # v7x-sized fallback (fits v5e/v6e too)


def _pick_hw_tile(hw, bytes_per_hw_col, budget_bytes):
    """Largest lane-aligned (multiple-of-128) hw tile whose live buffers fit.

    `bytes_per_hw_col` = total VMEM bytes per hw column across all pipelined
    in/out block buffers.  The tile need not divide hw: the caller uses a
    cdiv grid and Pallas clamps the ragged last block's DMA.
    """
    if hw <= 128:
        return hw                                 # last block dim == full extent
    max_cols = budget_bytes // max(bytes_per_hw_col, 1)
    budget_tile = max(128, (max_cols // 128) * 128)
    aligned_cap = (hw // 128) * 128               # largest lane-aligned tile <= hw
    tile = min(budget_tile, aligned_cap)
    # Prefer an exact divisor (no ragged/imbalanced last block) if one exists
    # without shrinking the tile by more than ~2x.
    if hw % 128 == 0:
        for t in range(tile, 127, -128):
            if hw % t == 0:
                if 2 * t >= tile:
                    return t
                break
    return tile


def mam_pallas(x_nchw, w1, gamma, beta, run_mean, run_var, w3,
               *, num_segments=8, alpha=0.5, eps=1e-5,
               compute_dtype=None, input_buffers=2):
    """x_nchw: (nt, C, H, W) like the PyTorch module. Returns (nt, C, H, W).

    compute_dtype: dtype of the MXU operands and of the output.  Default None ->
    follow x's dtype (pass bf16 x for the full 2x HBM-bandwidth win; the cast
    then fuses into the producer).  If set and != x.dtype, x is read from HBM in
    its native dtype and cast per tile inside the kernel (no extra HBM pass).
    """
    nt, c, h, w = x_nchw.shape
    assert nt % num_segments == 0
    n_batch = nt // num_segments
    cs = w1.shape[1]
    hw = h * w

    in_dtype = jnp.dtype(x_nchw.dtype)
    io_dtype = jnp.dtype(compute_dtype) if compute_dtype is not None else in_dtype

    # NCHW -> (n_batch, T, C, H*W): a pure reshape, no HBM relayout / cast pass.
    x = x_nchw.reshape(n_batch, num_segments, c, hw)

    # Fold eval-mode BatchNorm into conv1 (tiny weights; wrapper-side cast is free).
    scale = gamma * jax.lax.rsqrt(run_var + eps)              # (Cs,)
    w1t = (scale[:, None] * w1.T).astype(io_dtype)            # (Cs, C)
    b1 = (beta - run_mean * scale).reshape(cs, 1).astype(jnp.float32)
    w3t = w3.T.astype(io_dtype)                               # (C, Cs)

    # Generation-aware VMEM budgeting: ~75% of this chip's VMEM as the Mosaic
    # limit (96 MiB on 128-MiB v5e/v6e, 48 MiB on 64-MiB v7x); tile budget =
    # limit minus headroom for the (tiny) weights and pipeline bookkeeping.
    vmem_cap = _vmem_capacity_bytes()
    vmem_limit = min((vmem_cap * 3) // 4, 100 * 1024 * 1024)
    weight_bytes = (w1t.size + w3t.size) * io_dtype.itemsize + b1.size * 4
    budget = max(vmem_limit - 2 * weight_bytes - 2 * 1024 * 1024, 4 * 1024 * 1024)

    # Live buffers: `input_buffers` x-blocks + 2 output blocks (double-buffered).
    bytes_per_col = num_segments * c * (input_buffers * in_dtype.itemsize
                                        + 2 * io_dtype.itemsize)
    hw_tile = _pick_hw_tile(hw, bytes_per_col, budget)
    n_hw = -(-hw // hw_tile)                   # cdiv; ragged last block is clamped

    # v7x megacore: avoid a single odd parallel axis so both TensorCores get work
    # (v5e/v6e have one TC and are unaffected).
    if n_batch % 2 == 1 and n_hw == 1 and hw_tile > 128:
        hw_tile = max(128, (((hw_tile + 1) // 2 + 127) // 128) * 128)
        n_hw = -(-hw // hw_tile)

    kernel = functools.partial(
        _mam_kernel, num_segments=num_segments,
        c0=float(1.0 / (1.0 + alpha)), c1=float(alpha / (1.0 + alpha)))

    x_spec_kwargs = {}
    if input_buffers != 2:
        # Optional deeper input pipelining — only if profiling shows exposed DMA
        # at small tiles (re-check the VMEM budget above; caution on v7x).
        x_spec_kwargs["pipeline_mode"] = pl.Buffered(input_buffers)

    out = pl.pallas_call(
        kernel,
        out_shape=jax.ShapeDtypeStruct((n_batch, num_segments, c, hw), io_dtype),
        grid_spec=pltpu.PrefetchScalarGridSpec(
            num_scalar_prefetch=0,
            grid=(n_batch, n_hw),
            in_specs=[
                pl.BlockSpec((1, num_segments, c, hw_tile),
                             lambda b, j: (b, 0, 0, j), **x_spec_kwargs),  # x
                pl.BlockSpec((cs, c), lambda b, j: (0, 0)),   # BN-folded conv1^T
                pl.BlockSpec((cs, 1), lambda b, j: (0, 0)),   # folded BN bias
                pl.BlockSpec((c, cs), lambda b, j: (0, 0)),   # conv3^T
            ],
            out_specs=pl.BlockSpec((1, num_segments, c, hw_tile),
                                   lambda b, j: (b, 0, 0, j)),
        ),
        compiler_params=pltpu.CompilerParams(
            dimension_semantics=("parallel", "parallel"),
            vmem_limit_bytes=int(vmem_limit)),
    )(x, w1t, b1, w3t)

    # (n_batch, T, C, H*W) -> NCHW: again a pure reshape, no transpose.
    return out.reshape(nt, c, h, w)


def mam_reference(x_nchw, w1, gamma, beta, run_mean, run_var, w3,
                  *, num_segments=8, alpha=0.5, eps=1e-5):
    """Pure-JAX reference mirroring the PyTorch forward (eval-mode BN)."""
    nt, c, h, w = x_nchw.shape
    n_batch = nt // num_segments
    z = jnp.einsum('nchw,cd->ndhw', x_nchw, w1)                        # conv1
    inv_std = 1.0 / jnp.sqrt(run_var + eps)                            # bn1 (eval)
    z = (z - run_mean[None, :, None, None]) * inv_std[None, :, None, None]
    z = z * gamma[None, :, None, None] + beta[None, :, None, None]
    zr = z.reshape(n_batch, num_segments, -1, h, w)                    # temporal mix
    mapping0 = zr[:, :num_segments - 1]
    last = zr[:, num_segments - 1:]
    mapping1 = zr[:, 1:]
    avg_fwd = (mapping0 + alpha * mapping1) / (1.0 + alpha)
    a = jnp.concatenate([avg_fwd, last], axis=1).reshape(nt, -1, h, w)
    return jnp.einsum('ndhw,dc->nchw', a, w3)                          # conv3


if __name__ == "__main__":
    key = jax.random.PRNGKey(0)
    k_x, k_w1, k_w3, k_g, k_b, k_m, k_v = jax.random.split(key, 7)

    num_segments = 8
    n_batch = 2
    nt = n_batch * num_segments            # 16
    C = 128                                # input_channel (reduction=64 -> Cs=2)
    Cs = C // 64
    H = W = 16                             # hw = 256

    x = jax.random.normal(k_x, (nt, C, H, W), dtype=jnp.float32)

    # Deterministic synthetic parameters (not a checkpoint load).
    w1 = jax.random.normal(k_w1, (C, Cs), dtype=jnp.float32) * 0.05   # conv1 (C -> Cs)
    w3 = jax.random.normal(k_w3, (Cs, C), dtype=jnp.float32) * 0.05   # conv3 (Cs -> C)
    gamma = 1.0 + 0.1 * jax.random.normal(k_g, (Cs,), dtype=jnp.float32)
    beta = 0.1 * jax.random.normal(k_b, (Cs,), dtype=jnp.float32)
    run_mean = 0.1 * jax.random.normal(k_m, (Cs,), dtype=jnp.float32)
    run_var = jnp.abs(1.0 + 0.1 * jax.random.normal(k_v, (Cs,), dtype=jnp.float32))

    y_ref = jax.block_until_ready(mam_reference(
        x, w1, gamma, beta, run_mean, run_var, w3, num_segments=num_segments))

    # 1) f32 end-to-end (exact path; matches module dtype semantics).
    y = jax.block_until_ready(mam_pallas(
        x, w1, gamma, beta, run_mean, run_var, w3, num_segments=num_segments))
    assert y.shape == (nt, C, H, W), y.shape
    assert y.dtype == x.dtype
    assert jnp.allclose(y, y_ref, rtol=1e-4, atol=1e-5), "f32 mismatch vs reference"

    # 2) Producer hands bf16 (recommended production path on v5e/v6e/v7x:
    #    full 2x HBM-bandwidth win, bf16 MXU operands, f32 accumulation).
    y_bf16 = mam_pallas(x.astype(jnp.bfloat16), w1, gamma, beta, run_mean, run_var,
                        w3, num_segments=num_segments)
    y_bf16 = jax.block_until_ready(y_bf16).astype(jnp.float32)
    assert jnp.allclose(y_bf16, y_ref, rtol=2e-2, atol=2e-2), "bf16 mismatch vs reference"

    # 3) f32 input + compute_dtype=bf16: f32 reads, per-tile in-kernel cast,
    #    bf16 MXU + bf16 stores; no standalone HBM cast pass over x.
    y_mixed = mam_pallas(x, w1, gamma, beta, run_mean, run_var, w3,
                         num_segments=num_segments, compute_dtype=jnp.bfloat16)
    y_mixed = jax.block_until_ready(y_mixed).astype(jnp.float32)
    assert jnp.allclose(y_mixed, y_ref, rtol=2e-2, atol=2e-2), "mixed-precision mismatch"

    # 4) hw not divisible by 128 (12x12 = 144): exercises the clamped ragged
    #    last hw block that real MASNet spatial sizes (e.g. 56x56) require.
    x_r = jax.random.normal(k_x, (nt, C, 12, 12), dtype=jnp.float32)
    y_r_ref = jax.block_until_ready(mam_reference(
        x_r, w1, gamma, beta, run_mean, run_var, w3, num_segments=num_segments))
    y_r = jax.block_until_ready(mam_pallas(
        x_r, w1, gamma, beta, run_mean, run_var, w3, num_segments=num_segments))
    assert y_r.shape == x_r.shape
    assert jnp.allclose(y_r, y_r_ref, rtol=1e-4, atol=1e-5), "ragged-hw mismatch"

    print("KERNEL_OK")
</pallas_src>

<mosaic_0001>
module attributes {stable_mosaic.version = 11 : i64} {
  func.func @_mam_kernel(%arg0: i32, %arg1: i32, %arg2: memref<1x8x128x256xf32, #tpu.memory_space<vmem>>, %arg3: memref<2x128xf32, #tpu.memory_space<vmem>>, %arg4: memref<2x1xf32, #tpu.memory_space<vmem>>, %arg5: memref<128x2xf32, #tpu.memory_space<vmem>>, %arg6: memref<1x8x128x256xf32, #tpu.memory_space<vmem>>) attributes {dimension_semantics = [#tpu.dimension_semantics<parallel>, #tpu.dimension_semantics<parallel>], iteration_bounds = array<i64: 2, 1>, scalar_prefetch = 0 : i64, scratch_operands = 0 : i64, tpu.core_type = #tpu.core_type<tc>, window_params = [{transform_indices = @transform_0, window_bounds = array<i64: 1, 8, 128, 256>}, {pipeline_mode = #tpu.pipeline_mode<synchronous>, transform_indices = @transform_1, window_bounds = array<i64: 2, 128>}, {pipeline_mode = #tpu.pipeline_mode<synchronous>, transform_indices = @transform_2, window_bounds = array<i64: 2, 1>}, {pipeline_mode = #tpu.pipeline_mode<synchronous>, transform_indices = @transform_3, window_bounds = array<i64: 128, 2>}, {transform_indices = @transform_4, window_bounds = array<i64: 1, 8, 128, 256>}]} {
    %c0 = arith.constant 0 : index
    %c0_0 = arith.constant 0 : index
    %0 = vector.load %arg3[%c0, %c0_0] : memref<2x128xf32, #tpu.memory_space<vmem>>, vector<2x128xf32>
    %c0_1 = arith.constant 0 : index
    %c0_2 = arith.constant 0 : index
    %1 = vector.load %arg5[%c0_1, %c0_2] : memref<128x2xf32, #tpu.memory_space<vmem>>, vector<128x2xf32>
    %c0_3 = arith.constant 0 : index
    %c0_4 = arith.constant 0 : index
    %2 = vector.load %arg4[%c0_3, %c0_4] : memref<2x1xf32, #tpu.memory_space<vmem>>, vector<2x1xf32>
    %3 = vector.shape_cast %2 : vector<2x1xf32> to vector<2x1xf32>
    %4 = vector.broadcast %3 : vector<2x1xf32> to vector<2x256xf32>
    %c0_5 = arith.constant 0 : index
    %c0_6 = arith.constant 0 : index
    %c0_7 = arith.constant 0 : index
    %c0_8 = arith.constant 0 : index
    %5 = vector.load %arg2[%c0_5, %c0_6, %c0_7, %c0_8] : memref<1x8x128x256xf32, #tpu.memory_space<vmem>>, vector<1x1x128x256xf32>
    %6 = vector.shape_cast %5 : vector<1x1x128x256xf32> to vector<128x256xf32>
    %cst = arith.constant dense<0.000000e+00> : vector<2x256xf32>
    %7 = tpu.matmul %0, %6, %cst {dimension_numbers = #tpu.dot_dimension_numbers<[1], [0], [0], [1], [0, 0, 1, 1], [], []>} : vector<2x128xf32>, vector<128x256xf32>, vector<2x256xf32> -> vector<2x256xf32>
    %c0_9 = arith.constant 0 : index
    %c1 = arith.constant 1 : index
    %c0_10 = arith.constant 0 : index
    %c0_11 = arith.constant 0 : index
    %8 = vector.load %arg2[%c0_9, %c1, %c0_10, %c0_11] : memref<1x8x128x256xf32, #tpu.memory_space<vmem>>, vector<1x1x128x256xf32>
    %9 = vector.shape_cast %8 : vector<1x1x128x256xf32> to vector<128x256xf32>
    %cst_12 = arith.constant dense<0.000000e+00> : vector<2x256xf32>
    %10 = tpu.matmul %0, %9, %cst_12 {dimension_numbers = #tpu.dot_dimension_numbers<[1], [0], [0], [1], [0, 0, 1, 1], [], []>} : vector<2x128xf32>, vector<128x256xf32>, vector<2x256xf32> -> vector<2x256xf32>
    %cst_13 = arith.constant 0.666666686 : f32
    %11 = vector.broadcast %cst_13 : f32 to vector<2x256xf32>
    %12 = arith.mulf %11, %7 : vector<2x256xf32>
    %cst_14 = arith.constant 0.333333343 : f32
    %13 = vector.broadcast %cst_14 : f32 to vector<2x256xf32>
    %14 = arith.mulf %13, %10 : vector<2x256xf32>
    %15 = arith.addf %12, %14 : vector<2x256xf32>
    %16 = arith.addf %15, %4 : vector<2x256xf32>
    %cst_15 = arith.constant dense<0.000000e+00> : vector<128x256xf32>
    %17 = tpu.matmul %1, %16, %cst_15 {dimension_numbers = #tpu.dot_dimension_numbers<[1], [0], [0], [1], [0, 0, 1, 1], [], []>} : vector<128x2xf32>, vector<2x256xf32>, vector<128x256xf32> -> vector<128x256xf32>
    %c0_16 = arith.constant 0 : index
    %c0_17 = arith.constant 0 : index
    %c0_18 = arith.constant 0 : index
    %c0_19 = arith.constant 0 : index
    %18 = vector.load %arg6[%c0_16, %c0_17, %c0_18, %c0_19] : memref<1x8x128x256xf32, #tpu.memory_space<vmem>>, vector<1x1x128x256xf32>
    %19 = vector.shape_cast %18 : vector<1x1x128x256xf32> to vector<128x256xf32>
    %20 = vector.shape_cast %17 : vector<128x256xf32> to vector<1x1x128x256xf32>
    tpu.vector_store %arg6[%c0_16, %c0_17, %c0_18, %c0_19], %20 {strides = array<i32>} : memref<1x8x128x256xf32, #tpu.memory_space<vmem>>, vector<1x1x128x256xf32>,
    %c0_20 = arith.constant 0 : index
    %c2 = arith.constant 2 : index
    %c0_21 = arith.constant 0 : index
    %c0_22 = arith.constant 0 : index
    %21 = vector.load %arg2[%c0_20, %c2, %c0_21, %c0_22] : memref<1x8x128x256xf32, #tpu.memory_space<vmem>>, vector<1x1x128x256xf32>
    %22 = vector.shape_cast %21 : vector<1x1x128x256xf32> to vector<128x256xf32>
    %cst_23 = arith.constant dense<0.000000e+00> : vector<2x256xf32>
    %23 = tpu.matmul %0, %22, %cst_23 {dimension_numbers = #tpu.dot_dimension_numbers<[1], [0], [0], [1], [0, 0, 1, 1], [], []>} : vector<2x128xf32>, vector<128x256xf32>, vector<2x256xf32> -> vector<2x256xf32>
    %cst_24 = arith.constant 0.666666686 : f32
    %24 = vector.broadcast %cst_24 : f32 to vector<2x256xf32>
    %25 = arith.mulf %24, %10 : vector<2x256xf32>
    %cst_25 = arith.constant 0.333333343 : f32
    %26 = vector.broadcast %cst_25 : f32 to vector<2x256xf32>
    %27 = arith.mulf %26, %23 : vector<2x256xf32>
    %28 = arith.addf %25, %27 : vector<2x256xf32>
    %29 = arith.addf %28, %4 : vector<2x256xf32>
    %cst_26 = arith.constant dense<0.000000e+00> : vector<128x256xf32>
    %30 = tpu.matmul %1, %29, %cst_26 {dimension_numbers = #tpu.dot_dimension_numbers<[1], [0], [0], [1], [0, 0, 1, 1], [], []>} : vector<128x2xf32>, vector<2x256xf32>, vector<128x256xf32> -> vector<128x256xf32>
    %c0_27 = arith.constant 0 : index
    %c1_28 = arith.constant 1 : index
    %c0_29 = arith.constant 0 : index
    %c0_30 = arith.constant 0 : index
    %31 = vector.load %arg6[%c0_27, %c1_28, %c0_29, %c0_30] : memref<1x8x128x256xf32, #tpu.memory_space<vmem>>, vector<1x1x128x256xf32>
    %32 = vector.shape_cast %31 : vector<1x1x128x256xf32> to vector<128x256xf32>
    %33 = vector.shape_cast %30 : vector<128x256xf32> to vector<1x1x128x256xf32>
    tpu.vector_store %arg6[%c0_27, %c1_28, %c0_29, %c0_30], %33 {strides = array<i32>} : memref<1x8x128x256xf32, #tpu.memory_space<vmem>>, vector<1x1x128x256xf32>,
    %c0_31 = arith.constant 0 : index
    %c3 = arith.constant 3 : index
    %c0_32 = arith.constant 0 : index
    %c0_33 = arith.constant 0 : index
    %34 = vector.load %arg2[%c0_31, %c3, %c0_32, %c0_33] : memref<1x8x128x256xf32, #tpu.memory_space<vmem>>, vector<1x1x128x256xf32>
    %35 = vector.shape_cast %34 : vector<1x1x128x256xf32> to vector<128x256xf32>
    %cst_34 = arith.constant dense<0.000000e+00> : vector<2x256xf32>
    %36 = tpu.matmul %0, %35, %cst_34 {dimension_numbers = #tpu.dot_dimension_numbers<[1], [0], [0], [1], [0, 0, 1, 1], [], []>} : vector<2x128xf32>, vector<128x256xf32>, vector<2x256xf32> -> vector<2x256xf32>
    %cst_35 = arith.constant 0.666666686 : f32
    %37 = vector.broadcast %cst_35 : f32 to vector<2x256xf32>
    %38 = arith.mulf %37, %23 : vector<2x256xf32>
    %cst_36 = arith.constant 0.333333343 : f32
    %39 = vector.broadcast %cst_36 : f32 to vector<2x256xf32>
    %40 = arith.mulf %39, %36 : vector<2x256xf32>
    %41 = arith.addf %38, %40 : vector<2x256xf32>
    %42 = arith.addf %41, %4 : vector<2x256xf32>
    %cst_37 = arith.constant dense<0.000000e+00> : vector<128x256xf32>
    %43 = tpu.matmul %1, %42, %cst_37 {dimension_numbers = #tpu.dot_dimension_numbers<[1], [0], [0], [1], [0, 0, 1, 1], [], []>} : vector<128x2xf32>, vector<2x256xf32>, vector<128x256xf32> -> vector<128x256xf32>
    %c0_38 = arith.constant 0 : index
    %c2_39 = arith.constant 2 : index
    %c0_40 = arith.constant 0 : index
    %c0_41 = arith.constant 0 : index
    %44 = vector.load %arg6[%c0_38, %c2_39, %c0_40, %c0_41] : memref<1x8x128x256xf32, #tpu.memory_space<vmem>>, vector<1x1x128x256xf32>
    %45 = vector.shape_cast %44 : vector<1x1x128x256xf32> to vector<128x256xf32>
    %46 = vector.shape_cast %43 : vector<128x256xf32> to vector<1x1x128x256xf32>
    tpu.vector_store %arg6[%c0_38, %c2_39, %c0_40, %c0_41], %46 {strides = array<i32>} : memref<1x8x128x256xf32, #tpu.memory_space<vmem>>, vector<1x1x128x256xf32>,
    %c0_42 = arith.constant 0 : index
    %c4 = arith.constant 4 : index
    %c0_43 = arith.constant 0 : index
    %c0_44 = arith.constant 0 : index
    %47 = vector.load %arg2[%c0_42, %c4, %c0_43, %c0_44] : memref<1x8x128x256xf32, #tpu.memory_space<vmem>>, vector<1x1x128x256xf32>
    %48 = vector.shape_cast %47 : vector<1x1x128x256xf32> to vector<128x256xf32>
    %cst_45 = arith.constant dense<0.000000e+00> : vector<2x256xf32>
    %49 = tpu.matmul %0, %48, %cst_45 {dimension_numbers = #tpu.dot_dimension_numbers<[1], [0], [0], [1], [0, 0, 1, 1], [], []>} : vector<2x128xf32>, vector<128x256xf32>, vector<2x256xf32> -> vector<2x256xf32>
    %cst_46 = arith.constant 0.666666686 : f32
    %50 = vector.broadcast %cst_46 : f32 to vector<2x256xf32>
    %51 = arith.mulf %50, %36 : vector<2x256xf32>
    %cst_47 = arith.constant 0.333333343 : f32
    %52 = vector.broadcast %cst_47 : f32 to vector<2x256xf32>
    %53 = arith.mulf %52, %49 : vector<2x256xf32>
    %54 = arith.addf %51, %53 : vector<2x256xf32>
    %55 = arith.addf %54, %4 : vector<2x256xf32>
    %cst_48 = arith.constant dense<0.000000e+00> : vector<128x256xf32>
    %56 = tpu.matmul %1, %55, %cst_48 {dimension_numbers = #tpu.dot_dimension_numbers<[1], [0], [0], [1], [0, 0, 1, 1], [], []>} : vector<128x2xf32>, vector<2x256xf32>, vector<128x256xf32> -> vector<128x256xf32>
    %c0_49 = arith.constant 0 : index
    %c3_50 = arith.constant 3 : index
    %c0_51 = arith.constant 0 : index
    %c0_52 = arith.constant 0 : index
    %57 = vector.load %arg6[%c0_49, %c3_50, %c0_51, %c0_52] : memref<1x8x128x256xf32, #tpu.memory_space<vmem>>, vector<1x1x128x256xf32>
    %58 = vector.shape_cast %57 : vector<1x1x128x256xf32> to vector<128x256xf32>
    %59 = vector.shape_cast %56 : vector<128x256xf32> to vector<1x1x128x256xf32>
    tpu.vector_store %arg6[%c0_49, %c3_50, %c0_51, %c0_52], %59 {strides = array<i32>} : memref<1x8x128x256xf32, #tpu.memory_space<vmem>>, vector<1x1x128x256xf32>,
    %c0_53 = arith.constant 0 : index
    %c5 = arith.constant 5 : index
    %c0_54 = arith.constant 0 : index
    %c0_55 = arith.constant 0 : index
    %60 = vector.load %arg2[%c0_53, %c5, %c0_54, %c0_55] : memref<1x8x128x256xf32, #tpu.memory_space<vmem>>, vector<1x1x128x256xf32>
    %61 = vector.shape_cast %60 : vector<1x1x128x256xf32> to vector<128x256xf32>
    %cst_56 = arith.constant dense<0.000000e+00> : vector<2x256xf32>
    %62 = tpu.matmul %0, %61, %cst_56 {dimension_numbers = #tpu.dot_dimension_numbers<[1], [0], [0], [1], [0, 0, 1, 1], [], []>} : vector<2x128xf32>, vector<128x256xf32>, vector<2x256xf32> -> vector<2x256xf32>
    %cst_57 = arith.constant 0.666666686 : f32
    %63 = vector.broadcast %cst_57 : f32 to vector<2x256xf32>
    %64 = arith.mulf %63, %49 : vector<2x256xf32>
    %cst_58 = arith.constant 0.333333343 : f32
    %65 = vector.broadcast %cst_58 : f32 to vector<2x256xf32>
    %66 = arith.mulf %65, %62 : vector<2x256xf32>
    %67 = arith.addf %64, %66 : vector<2x256xf32>
    %68 = arith.addf %67, %4 : vector<2x256xf32>
    %cst_59 = arith.constant dense<0.000000e+00> : vector<128x256xf32>
    %69 = tpu.matmul %1, %68, %cst_59 {dimension_numbers = #tpu.dot_dimension_numbers<[1], [0], [0], [1], [0, 0, 1, 1], [], []>} : vector<128x2xf32>, vector<2x256xf32>, vector<128x256xf32> -> vector<128x256xf32>
    %c0_60 = arith.constant 0 : index
    %c4_61 = arith.constant 4 : index
    %c0_62 = arith.constant 0 : index
    %c0_63 = arith.constant 0 : index
    %70 = vector.load %arg6[%c0_60, %c4_61, %c0_62, %c0_63] : memref<1x8x128x256xf32, #tpu.memory_space<vmem>>, vector<1x1x128x256xf32>
    %71 = vector.shape_cast %70 : vector<1x1x128x256xf32> to vector<128x256xf32>
    %72 = vector.shape_cast %69 : vector<128x256xf32> to vector<1x1x128x256xf32>
    tpu.vector_store %arg6[%c0_60, %c4_61, %c0_62, %c0_63], %72 {strides = array<i32>} : memref<1x8x128x256xf32, #tpu.memory_space<vmem>>, vector<1x1x128x256xf32>,
    %c0_64 = arith.constant 0 : index
    %c6 = arith.constant 6 : index
    %c0_65 = arith.constant 0 : index
    %c0_66 = arith.constant 0 : index
    %73 = vector.load %arg2[%c0_64, %c6, %c0_65, %c0_66] : memref<1x8x128x256xf32, #tpu.memory_space<vmem>>, vector<1x1x128x256xf32>
    %74 = vector.shape_cast %73 : vector<1x1x128x256xf32> to vector<128x256xf32>
    %cst_67 = arith.constant dense<0.000000e+00> : vector<2x256xf32>
    %75 = tpu.matmul %0, %74, %cst_67 {dimension_numbers = #tpu.dot_dimension_numbers<[1], [0], [0], [1], [0, 0, 1, 1], [], []>} : vector<2x128xf32>, vector<128x256xf32>, vector<2x256xf32> -> vector<2x256xf32>
    %cst_68 = arith.constant 0.666666686 : f32
    %76 = vector.broadcast %cst_68 : f32 to vector<2x256xf32>
    %77 = arith.mulf %76, %62 : vector<2x256xf32>
    %cst_69 = arith.constant 0.333333343 : f32
    %78 = vector.broadcast %cst_69 : f32 to vector<2x256xf32>
    %79 = arith.mulf %78, %75 : vector<2x256xf32>
    %80 = arith.addf %77, %79 : vector<2x256xf32>
    %81 = arith.addf %80, %4 : vector<2x256xf32>
    %cst_70 = arith.constant dense<0.000000e+00> : vector<128x256xf32>
    %82 = tpu.matmul %1, %81, %cst_70 {dimension_numbers = #tpu.dot_dimension_numbers<[1], [0], [0], [1], [0, 0, 1, 1], [], []>} : vector<128x2xf32>, vector<2x256xf32>, vector<128x256xf32> -> vector<128x256xf32>
    %c0_71 = arith.constant 0 : index
    %c5_72 = arith.constant 5 : index
    %c0_73 = arith.constant 0 : index
    %c0_74 = arith.constant 0 : index
    %83 = vector.load %arg6[%c0_71, %c5_72, %c0_73, %c0_74] : memref<1x8x128x256xf32, #tpu.memory_space<vmem>>, vector<1x1x128x256xf32>
    %84 = vector.shape_cast %83 : vector<1x1x128x256xf32> to vector<128x256xf32>
    %85 = vector.shape_cast %82 : vector<128x256xf32> to vector<1x1x128x256xf32>
    tpu.vector_store %arg6[%c0_71, %c5_72, %c0_73, %c0_74], %85 {strides = array<i32>} : memref<1x8x128x256xf32, #tpu.memory_space<vmem>>, vector<1x1x128x256xf32>,
    %c0_75 = arith.constant 0 : index
    %c7 = arith.constant 7 : index
    %c0_76 = arith.constant 0 : index
    %c0_77 = arith.constant 0 : index
    %86 = vector.load %arg2[%c0_75, %c7, %c0_76, %c0_77] : memref<1x8x128x256xf32, #tpu.memory_space<vmem>>, vector<1x1x128x256xf32>
    %87 = vector.shape_cast %86 : vector<1x1x128x256xf32> to vector<128x256xf32>
    %cst_78 = arith.constant dense<0.000000e+00> : vector<2x256xf32>
    %88 = tpu.matmul %0, %87, %cst_78 {dimension_numbers = #tpu.dot_dimension_numbers<[1], [0], [0], [1], [0, 0, 1, 1], [], []>} : vector<2x128xf32>, vector<128x256xf32>, vector<2x256xf32> -> vector<2x256xf32>
    %cst_79 = arith.constant 0.666666686 : f32
    %89 = vector.broadcast %cst_79 : f32 to vector<2x256xf32>
    %90 = arith.mulf %89, %75 : vector<2x256xf32>
    %cst_80 = arith.constant 0.333333343 : f32
    %91 = vector.broadcast %cst_80 : f32 to vector<2x256xf32>
    %92 = arith.mulf %91, %88 : vector<2x256xf32>
    %93 = arith.addf %90, %92 : vector<2x256xf32>
    %94 = arith.addf %93, %4 : vector<2x256xf32>
    %cst_81 = arith.constant dense<0.000000e+00> : vector<128x256xf32>
    %95 = tpu.matmul %1, %94, %cst_81 {dimension_numbers = #tpu.dot_dimension_numbers<[1], [0], [0], [1], [0, 0, 1, 1], [], []>} : vector<128x2xf32>, vector<2x256xf32>, vector<128x256xf32> -> vector<128x256xf32>
    %c0_82 = arith.constant 0 : index
    %c6_83 = arith.constant 6 : index
    %c0_84 = arith.constant 0 : index
    %c0_85 = arith.constant 0 : index
    %96 = vector.load %arg6[%c0_82, %c6_83, %c0_84, %c0_85] : memref<1x8x128x256xf32, #tpu.memory_space<vmem>>, vector<1x1x128x256xf32>
    %97 = vector.shape_cast %96 : vector<1x1x128x256xf32> to vector<128x256xf32>
    %98 = vector.shape_cast %95 : vector<128x256xf32> to vector<1x1x128x256xf32>
    tpu.vector_store %arg6[%c0_82, %c6_83, %c0_84, %c0_85], %98 {strides = array<i32>} : memref<1x8x128x256xf32, #tpu.memory_space<vmem>>, vector<1x1x128x256xf32>,
    %99 = arith.addf %88, %4 : vector<2x256xf32>
    %cst_86 = arith.constant dense<0.000000e+00> : vector<128x256xf32>
    %100 = tpu.matmul %1, %99, %cst_86 {dimension_numbers = #tpu.dot_dimension_numbers<[1], [0], [0], [1], [0, 0, 1, 1], [], []>} : vector<128x2xf32>, vector<2x256xf32>, vector<128x256xf32> -> vector<128x256xf32>
    %c0_87 = arith.constant 0 : index
    %c7_88 = arith.constant 7 : index
    %c0_89 = arith.constant 0 : index
    %c0_90 = arith.constant 0 : index
    %101 = vector.load %arg6[%c0_87, %c7_88, %c0_89, %c0_90] : memref<1x8x128x256xf32, #tpu.memory_space<vmem>>, vector<1x1x128x256xf32>
    %102 = vector.shape_cast %101 : vector<1x1x128x256xf32> to vector<128x256xf32>
    %103 = vector.shape_cast %100 : vector<128x256xf32> to vector<1x1x128x256xf32>
    tpu.vector_store %arg6[%c0_87, %c7_88, %c0_89, %c0_90], %103 {strides = array<i32>} : memref<1x8x128x256xf32, #tpu.memory_space<vmem>>, vector<1x1x128x256xf32>,
    return
  }
  func.func @transform_0(%arg0: i32, %arg1: i32) -> (i32, i32, i32, i32) {
    %c0_i32 = arith.constant 0 : i32
    %c0_i32_0 = arith.constant 0 : i32
    %c0_i32_1 = arith.constant 0 : i32
    return %arg0, %c0_i32, %c0_i32_0, %arg1 : i32, i32, i32, i32
  }
  func.func @transform_1(%arg0: i32, %arg1: i32) -> (i32, i32) {
    %c0_i32 = arith.constant 0 : i32
    %c0_i32_0 = arith.constant 0 : i32
    %c0_i32_1 = arith.constant 0 : i32
    return %c0_i32, %c0_i32_0 : i32, i32
  }
  func.func @transform_2(%arg0: i32, %arg1: i32) -> (i32, i32) {
    %c0_i32 = arith.constant 0 : i32
    %c0_i32_0 = arith.constant 0 : i32
    %c0_i32_1 = arith.constant 0 : i32
    return %c0_i32, %c0_i32_0 : i32, i32
  }
  func.func @transform_3(%arg0: i32, %arg1: i32) -> (i32, i32) {
    %c0_i32 = arith.constant 0 : i32
    %c0_i32_0 = arith.constant 0 : i32
    %c0_i32_1 = arith.constant 0 : i32
    return %c0_i32, %c0_i32_0 : i32, i32
  }
  func.func @transform_4(%arg0: i32, %arg1: i32) -> (i32, i32, i32, i32) {
    %c0_i32 = arith.constant 0 : i32
    %c0_i32_0 = arith.constant 0 : i32
    %c0_i32_1 = arith.constant 0 : i32
    return %arg0, %c0_i32, %c0_i32_0, %arg1 : i32, i32, i32, i32
  }
}

</mosaic_0001>

<bundles_post_ra>
// kernel: tpu_custom_call.1
= control target key start
LH: loop header
LB: loop body
LE: loop exit
PB: predicated region body
PF: predicated region fallthrough
CT: control target
= control target key end

     0   :  { %s4876_s0 = inlined_call_operand.hbm [shape: f32[2,8,128,256], index: 0, kind: input, shape index: {}]   ;;  %s4877_s1 = inlined_call_operand.hbm [shape: f32[2,128], index: 1, kind: input, shape index: {}]   ;;  %s4878_s2 = inlined_call_operand.vmem [shape: f32[2,1], index: 2, kind: input, shape index: {}]   ;;  %s4879_s3 = inlined_call_operand.vmem [shape: f32[128,2], index: 3, kind: input, shape index: {}]   ;;  %s4880_s4 = inlined_call_operand.hbm [shape: f32[2,8,128,256], index: 4, kind: output, shape index: {}]  }
   0x1   :  { %4883 = sst [smem:[#allocation12_spill]] %s4877_s1 }
   0x2   :  { %9 = vsyncpa [#allocation3], 0 }
   0x3   :  { %11 = vsyncpa [#allocation3 + $0x1], 0 }
   0x4   :  { %12 = vsyncpa [#allocation6], 0 }
   0x5   :  { %13 = vsyncpa [#allocation4], 0 }
   0x6   :  { %15 = vsyncpa [#allocation4 + $0x1], 0  ;;  %s3449_s15 = smov 0   ;;  %s3451_s16 = smov 0  }
   0x7   :  { %s3453_s17 = smov 0   ;;  %s3455_s18 = smov 0  }
   0x8   :  { %s3457_s19 = smov 0   ;;  %s3459_s20 = smov 0  }
   0x9 LB: > { %4884 = sst [smem:[#allocation11_spill]] %s3416_s20  ;;  %s2433_s21 = sadd.s32 4294967295, %s3416_s20   ;;  %s3416_s20 = sphi %s3459_s20, %s21_s20   ;;  %s3412_s19 = sphi %s3457_s19, %s4898_s19   ;;  %s3408_s18 = sphi %s3455_s18, %s4897_s18   ;;  %s3404_s17 = sphi %s3453_s17, %s4896_s17   ;;  %s3400_s16 = sphi %s3451_s16, %s4895_s16   ;;  %s3396_s15 = sphi %s3449_s15, %s4894_s15  }
   0xa   : > { %s2434_s22 = sadd.s32 4294967294, %s3416_s20   ;;  %s42_s23 = sadd.s32 1, %s3404_s17 }
   0xb   : > { %p49_p0 = scmp.ne.s32.totalorder %s3404_s17, %s3400_s16  ;;  %p50_p1 = scmp.eq.s32.totalorder %s3416_s20, 0 }
   0xc   : > { %p55_p2 = scmp.ne.s32.totalorder %s3400_s16, %s3396_s15  ;;  %p3487_p3 = scmp.eq.s32.totalorder %s2433_s21, 0 }
   0xd   : > { %p144_p4 = scmp.eq.s32.totalorder %s2433_s21, 1  ;;  %p3491_p5 = por %p50_p1, %p49_p0 }
   0xe   : > { %p150_p6 = scmp.eq.s32.totalorder %s2434_s22, 1  ;;  %p3497_p7 = por %p3487_p3, %p55_p2 }
   0xf   : > { %p3501_p8 = por %p144_p4, %p49_p0  ;;  %p2435_p10 = scmp.ge.s32.totalorder %s3416_s20, 1 }
  0x10   : > { %p3505_p9 = por %p150_p6, %p55_p2  ;;  %p157_p11 = scmp.lt.s32.totalorder %s3416_s20, 3 }
  0x11   : > { %s4890_s1 = sld [smem:[#allocation12_spill]]  ;;  %s3418_s7 = smov [#allocation5]  }
  0x12   : > { %p3514_p12 = pnand %p2435_p10, %p157_p11  ;;  %s171_s8 = sshll.u32 %s3418_s7, 4  ;;  %s172_s8 = int_to_ptr.vmem [resolvable:$true] %s171_s8 }
  0x13   : > { %p2437_p13 = scmp.ge.s32.totalorder %s3416_s20, 2  ;;  %p3195_p1 = scmp.lt.s32.totalorder %s3416_s20, 2 }
  0x14   : > { %p3182_p0 = pneg %p3514_p12  ;;  %s33_s10 = sadd.s32 1, %s3412_s19 }
  0x15   : > { %p3526_p4 = pnand %p3195_p1, %p3491_p5  ;;  %p35_p6 = scmp.ge.s32.totalorder %s33_s10, 2 }
  0x16   : > { %p3183_p2 = pnand %p3182_p0, %p3487_p3  ;;  %s188_s11 = sand.u32 1, %s3404_s17  }
  0x17   : > { %s169_s5 = sshll.u32 %s4890_s1, 4  ;;  %s4900_s10 = smov (%p35_p6, %s33_s10), 0  ;;  %s170_s5 = int_to_ptr.hbm [resolvable:$true] %s169_s5 }
  0x18   : > { %3185 = dma.hbm_to_vmem [thread:$0]  (!%p3183_p2), %s170_s5, 32, %s172_s8, [#allocation6]  }
  0x19   : > { %s2438_s12 = sshll.u32 %s188_s11, 11  ;;  %s37_s13 = ssub.s32 %s3412_s19, %s4900_s10 }
  0x1a   : > { %p40_p10 = scmp.eq.s32.totalorder %s37_s13, 0  ;;  %s3170_s14 = sshll.u32 %s3412_s19, 11 }
  0x1b   : > { %s199_s25 = scalar_lea.hbm %s4876_s0, %s3170_s14  ;;  %s192_s29 = scalar_lea.vmem [#allocation2], %s2438_s12 }
  0x1c   : > { %s202_s30 = sshll.u32 %s192_s29, 4  ;;  %s200_s1 = sshll.u32 %s199_s25, 4  ;;  %s203_s30 = int_to_ptr.vmem [resolvable:$true] %s202_s30  ;;  %s201_s1 = int_to_ptr.hbm [resolvable:$true] %s200_s1 }
  0x1d   : > { %s3543_s7 = scalar_select %p40_p10, %s3404_s17, %s42_s23  }
  0x1e   : > { %s189_s5 = scalar_lea.sflag [#allocation3], %s188_s11  ;;  %s3419_s8 = smov 256  }
  0x1f   : > { %s3420_s20 = smov 16   ;;  %214 = sbr.rel (%p3514_p12) target bundleno = 1253 (0x4e5), region = 36 }
  0x20   : > { %3189 = dma.hbm_to_vmem [thread:$0]  (!%p3526_p4), %s201_s1, 32768, %s203_s30, %s189_s5, %s3419_s8, %s3419_s8, %s3420_s20  }
  0x21   : > { %s3550_s13 = sand.u32 (!%p3514_p12), 1, %s3400_s16  }
  0x22   : > { %s2442_s23 = sshll.u32 (!%p3514_p12), %s3550_s13, 11  ;;  %s217_s12 = scalar_lea.sflag (!%p3514_p12), [#allocation3], %s3550_s13 }
  0x23   : > { %s3556_s14 = scalar_lea.vmem (!%p3514_p12), [#allocation2], %s2442_s23 }
  0x24   : > { %3383 = dma.done.wait (%p3497_p7), %s217_s12, 32768  }
  0x25   : > { %3385 = vsyncadd (%p3497_p7), %s217_s12, 4294934528 }
  0x26   : > { %3387 = dma.done.wait (%p3487_p3), [#allocation6], 32  }
  0x27   : > { %3389 = vsyncadd (%p3487_p3), [#allocation6], 4294967264  ;;  %v2475_v0 = vld [vmem:[%s3556_s14 + $0x1f0] sm:$0xff]  ;;  %v2476_v1 = vld [vmem:[%s3556_s14 + $0x1f8] sm:$0xff]  ;;  %vm478_vm0 = vcmask 1041408   ;;  %vm429_vm1 = vcmask 15360  }
  0x28   : > { %v2473_v2 = vld [vmem:[%s3556_s14 + $0x1e0] sm:$0xff]  ;;  %381 = vmatpush.msra.mxu2 %v2475_v0  ;;  %401 = vmatpush.msra.mxu3 %v2476_v1  ;;  %v2474_v3 = vld [vmem:[%s3556_s14 + $0x1e8] sm:$0xff]  ;;  %v2471_v4 = vld [vmem:[%s3556_s14 + $0x1d0] sm:$0xff]  ;;  %s3939_s6 = scalar_lea.vmem [#allocation7], %s2442_s23  ;;  %s3171_s9 = sshll.u32 %s3408_s18, 11 }
  0x29   : > { %v2472_v5 = vld [vmem:[%s3556_s14 + $0x1d8] sm:$0xff]  ;;  %v306_v6 = vld [vmem:[%s3556_s14 + $0xf0] sm:$0xff]  ;;  %v304_v8 = vld [vmem:[%s3556_s14 + $0xe0] sm:$0xff]  ;;  %s2332_s22 = scalar_lea.hbm %s4880_s4, %s3171_s9  ;;  %s2333_s25 = sshll.u32 %s3939_s6, 4  ;;  %s2334_s25 = int_to_ptr.vmem [resolvable:$true] %s2333_s25 }
  0x2a   : > { %v307_v7 = vld [vmem:[%s3556_s14 + $0xf8] sm:$0xff]  ;;  %382 = vmatpush.msra.mxu2 %v2473_v2  ;;  %402 = vmatpush.msra.mxu3 %v2474_v3  ;;  %v305_v9 = vld [vmem:[%s3556_s14 + $0xe8] sm:$0xff]  ;;  %v2469_v10 = vld [vmem:[%s3556_s14 + $0x1c0] sm:$0xff]  ;;  %s2335_s29 = sshll.u32 %s2332_s22, 4  ;;  %s2319_s30 = scalar_lea.sflag [#allocation4], %s3550_s13  ;;  %s2336_s29 = int_to_ptr.hbm [resolvable:$true] %s2335_s29 }
  0x2b   : > { %308 = vmatpush.msra.mxu0 %v306_v6  ;;  %328 = vmatpush.msra.mxu1 %v307_v7  ;;  %v2470_v11 = vld [vmem:[%s3556_s14 + $0x1c8] sm:$0xff]  ;;  %v302_v12 = vld [vmem:[%s3556_s14 + $0xd0] sm:$0xff]  ;;  %v303_v13 = vld [vmem:[%s3556_s14 + $0xd8] sm:$0xff]  ;;  %s3344_s5 = sshra.s32 %s2336_s29, 4  ;;  %s3345_s5 = int_to_ptr.hbm [resolvable:$true] %s3344_s5 }
  0x2c   : > { %383 = vmatpush.msra.mxu2 %v2471_v4  ;;  %403 = vmatpush.msra.mxu3 %v2472_v5  ;;  %v2467_v14 = vld [vmem:[%s3556_s14 + $0x1b0] sm:$0xff]  ;;  %v2468_v15 = vld [vmem:[%s3556_s14 + $0x1b8] sm:$0xff]  ;;  %v300_v16 = vld [vmem:[%s3556_s14 + $0xc0] sm:$0xff]  ;;  %s3346_s18 = scalar_lea.hbm %s3345_s5, 2048  ;;  %p3351_p11 = scmp.lt.s32.totalorder %s3345_s5, %s4880_s4 }
  0x2d   : > { %309 = vmatpush.msra.mxu0 %v304_v8  ;;  %329 = vmatpush.msra.mxu1 %v305_v9  ;;  %v301_v17 = vld [vmem:[%s3556_s14 + $0xc8] sm:$0xff]  ;;  %v2465_v18 = vld [vmem:[%s3556_s14 + $0x1a0] sm:$0xff]  ;;  %v298_v20 = vld [vmem:[%s3556_s14 + $0xb0] sm:$0xff]  ;;  %p3347_p3 = scmp.ne.s32.totalorder %s3345_s5, %s3346_s18 }
  0x2e   : > { %384 = vmatpush.msra.mxu2 %v2469_v10  ;;  %404 = vmatpush.msra.mxu3 %v2470_v11  ;;  %v2466_v19 = vld [vmem:[%s3556_s14 + $0x1a8] sm:$0xff]  ;;  %v299_v21 = vld [vmem:[%s3556_s14 + $0xb8] sm:$0xff]  ;;  %v2463_v22 = vld [vmem:[%s3556_s14 + $0x190] sm:$0xff] }
  0x2f   : > { %310 = vmatpush.msra.mxu0 %v302_v12  ;;  %330 = vmatpush.msra.mxu1 %v303_v13  ;;  %v2464_v23 = vld [vmem:[%s3556_s14 + $0x198] sm:$0xff]  ;;  %v296_v24 = vld [vmem:[%s3556_s14 + $0xa0] sm:$0xff]  ;;  %v297_v25 = vld [vmem:[%s3556_s14 + $0xa8] sm:$0xff]  ;;  %p3348_p5 = pnand %p3347_p3, %p3501_p8 }
  0x30   : > { %385 = vmatpush.msra.mxu2 %v2467_v14  ;;  %405 = vmatpush.msra.mxu3 %v2468_v15  ;;  %v2461_v26 = vld [vmem:[%s3556_s14 + $0x180] sm:$0xff]  ;;  %v2462_v27 = vld [vmem:[%s3556_s14 + $0x188] sm:$0xff]  ;;  %v294_v28 = vld [vmem:[%s3556_s14 + $0x90] sm:$0xff]  ;;  %v3421_v14 = vmov 0  }
  0x31   : > { %311 = vmatpush.msra.mxu0 %v300_v16  ;;  %331 = vmatpush.msra.mxu1 %v301_v17  ;;  %v295_v29 = vld [vmem:[%s3556_s14 + $0x98] sm:$0xff]  ;;  %v2459_v30 = vld [vmem:[%s3556_s14 + $0x170] sm:$0xff]  ;;  %v292_v32 = vld [vmem:[%s3556_s14 + $0x80] sm:$0xff]  ;;  %p3349_p7 = pneg %p3348_p5 }
  0x32   : > { %386 = vmatpush.msra.mxu2 %v2465_v18  ;;  %406 = vmatpush.msra.mxu3 %v2466_v19  ;;  %v2460_v31 = vld [vmem:[%s3556_s14 + $0x178] sm:$0xff]  ;;  %v293_v33 = vld [vmem:[%s3556_s14 + $0x88] sm:$0xff]  ;;  %v2457_v34 = vld [vmem:[%s3556_s14 + $0x160] sm:$0xff] }
  0x33   : > { %312 = vmatpush.msra.mxu0 %v298_v20  ;;  %332 = vmatpush.msra.mxu1 %v299_v21  ;;  %v2458_v35 = vld [vmem:[%s3556_s14 + $0x168] sm:$0xff]  ;;  %v290_v36 = vld [vmem:[%s3556_s14 + $0x70] sm:$0xff]  ;;  %v291_v37 = vld [vmem:[%s3556_s14 + $0x78] sm:$0xff] }
  0x34   : > { %387 = vmatpush.msra.mxu2 %v2463_v22  ;;  %407 = vmatpush.msra.mxu3 %v2464_v23  ;;  %v2455_v38 = vld [vmem:[%s3556_s14 + $0x150] sm:$0xff]  ;;  %v2456_v39 = vld [vmem:[%s3556_s14 + $0x158] sm:$0xff]  ;;  %v288_v40 = vld [vmem:[%s3556_s14 + $0x60] sm:$0xff] }
  0x35   : > { %313 = vmatpush.msra.mxu0 %v296_v24  ;;  %333 = vmatpush.msra.mxu1 %v297_v25  ;;  %v289_v41 = vld [vmem:[%s3556_s14 + $0x68] sm:$0xff]  ;;  %v2453_v42 = vld [vmem:[%s3556_s14 + $0x140] sm:$0xff]  ;;  %v286_v44 = vld [vmem:[%s3556_s14 + $0x50] sm:$0xff] }
  0x36   : > { %388 = vmatpush.msra.mxu2 %v2461_v26  ;;  %408 = vmatpush.msra.mxu3 %v2462_v27  ;;  %v2454_v43 = vld [vmem:[%s3556_s14 + $0x148] sm:$0xff]  ;;  %v287_v45 = vld [vmem:[%s3556_s14 + $0x58] sm:$0xff]  ;;  %v2451_v46 = vld [vmem:[%s3556_s14 + $0x130] sm:$0xff] }
  0x37   : > { %314 = vmatpush.msra.mxu0 %v294_v28  ;;  %334 = vmatpush.msra.mxu1 %v295_v29  ;;  %v2452_v47 = vld [vmem:[%s3556_s14 + $0x138] sm:$0xff]  ;;  %v284_v48 = vld [vmem:[%s3556_s14 + $0x40] sm:$0xff]  ;;  %v285_v49 = vld [vmem:[%s3556_s14 + $0x48] sm:$0xff] }
  0x38   : > { %389 = vmatpush.msra.mxu2 %v2459_v30  ;;  %409 = vmatpush.msra.mxu3 %v2460_v31  ;;  %v2449_v50 = vld [vmem:[%s3556_s14 + $0x120] sm:$0xff]  ;;  %v2450_v51 = vld [vmem:[%s3556_s14 + $0x128] sm:$0xff]  ;;  %v282_v52 = vld [vmem:[%s3556_s14 + $0x30] sm:$0xff] }
  0x39   : > { %315 = vmatpush.msra.mxu0 %v292_v32  ;;  %335 = vmatpush.msra.mxu1 %v293_v33  ;;  %v283_v53 = vld [vmem:[%s3556_s14 + $0x38] sm:$0xff]  ;;  %v2447_v54 = vld [vmem:[%s3556_s14 + $0x110] sm:$0xff]  ;;  %v280_v56 = vld [vmem:[%s3556_s14 + $0x20] sm:$0xff] }
  0x3a   : > { %390 = vmatpush.msra.mxu2 %v2457_v34  ;;  %410 = vmatpush.msra.mxu3 %v2458_v35  ;;  %v2448_v55 = vld [vmem:[%s3556_s14 + $0x118] sm:$0xff]  ;;  %v281_v57 = vld [vmem:[%s3556_s14 + $0x28] sm:$0xff]  ;;  %v2445_v58 = vld [vmem:[%s3556_s14 + $0x100] sm:$0xff] }
  0x3b   : > { %316 = vmatpush.msra.mxu0 %v290_v36  ;;  %336 = vmatpush.msra.mxu1 %v291_v37  ;;  %v2446_v59 = vld [vmem:[%s3556_s14 + $0x108] sm:$0xff]  ;;  %v3626_v60 = vld [vmem:[#allocation5] sm:$0x3]  ;;  %v2541_v61 = vld [vmem:[%s3556_s14 + $0x2f0] sm:$0xff] }
  0x3c   : > { %391 = vmatpush.msra.mxu2 %v2455_v38  ;;  %411 = vmatpush.msra.mxu3 %v2456_v39  ;;  %v2542_v62 = vld [vmem:[%s3556_s14 + $0x2f8] sm:$0xff]  ;;  %v278_v63 = vld [vmem:[%s3556_s14 + $0x10] sm:$0xff]  ;;  %v2539_v1 = vld [vmem:[%s3556_s14 + $0x2e0] sm:$0xff] }
  0x3d   : > { %317 = vmatpush.msra.mxu0 %v288_v40  ;;  %337 = vmatpush.msra.mxu1 %v289_v41  ;;  %v279_v0 = vld [vmem:[%s3556_s14 + $0x18] sm:$0xff]  ;;  %v2540_v2 = vld [vmem:[%s3556_s14 + $0x2e8] sm:$0xff]  ;;  %v276_v3 = vld [vmem:[%s3556_s14] sm:$0xff] }
  0x3e   : > { %392 = vmatpush.msra.mxu2 %v2453_v42  ;;  %412 = vmatpush.msra.mxu3 %v2454_v43  ;;  %v277_v4 = vld [vmem:[%s3556_s14 + $0x8] sm:$0xff]  ;;  %v2537_v5 = vld [vmem:[%s3556_s14 + $0x2d0] sm:$0xff]  ;;  %v2538_v6 = vld [vmem:[%s3556_s14 + $0x2d8] sm:$0xff] }
  0x3f   : > { %318 = vmatpush.msra.mxu0 %v286_v44  ;;  %338 = vmatpush.msra.mxu1 %v287_v45  ;;  %v2535_v7 = vld [vmem:[%s3556_s14 + $0x2c0] sm:$0xff]  ;;  %v2536_v8 = vld [vmem:[%s3556_s14 + $0x2c8] sm:$0xff]  ;;  %v2533_v9 = vld [vmem:[%s3556_s14 + $0x2b0] sm:$0xff] }
  0x40   : > { %393 = vmatpush.msra.mxu2 %v2451_v46  ;;  %413 = vmatpush.msra.mxu3 %v2452_v47  ;;  %v2534_v10 = vld [vmem:[%s3556_s14 + $0x2b8] sm:$0xff]  ;;  %v270_v11 = vld [vmem:[%s4878_s2] sm:$0x3]  ;;  %v2532_v13 = vld [vmem:[%s3556_s14 + $0x2a8] sm:$0xff] }
  0x41   : > { %319 = vmatpush.msra.mxu0 %v284_v48  ;;  %339 = vmatpush.msra.mxu1 %v285_v49  ;;  %v2531_v12 = vld [vmem:[%s3556_s14 + $0x2a0] sm:$0xff]  ;;  %v2529_v15 = vld [vmem:[%s3556_s14 + $0x290] sm:$0xff]  ;;  %v2530_v16 = vld [vmem:[%s3556_s14 + $0x298] sm:$0xff] }
  0x42   : > { %394 = vmatpush.msra.mxu2 %v2449_v50  ;;  %414 = vmatpush.msra.mxu3 %v2450_v51  ;;  %v2527_v17 = vld [vmem:[%s3556_s14 + $0x280] sm:$0xff]  ;;  %v2528_v18 = vld [vmem:[%s3556_s14 + $0x288] sm:$0xff]  ;;  %v2525_v19 = vld [vmem:[%s3556_s14 + $0x270] sm:$0xff] }
  0x43   : > { %320 = vmatpush.msra.mxu0 %v282_v52  ;;  %340 = vmatpush.msra.mxu1 %v283_v53  ;;  %v2526_v20 = vld [vmem:[%s3556_s14 + $0x278] sm:$0xff]  ;;  %v2523_v21 = vld [vmem:[%s3556_s14 + $0x260] sm:$0xff]  ;;  %v2524_v22 = vld [vmem:[%s3556_s14 + $0x268] sm:$0xff] }
  0x44   : > { %395 = vmatpush.msra.mxu2 %v2447_v54  ;;  %415 = vmatpush.msra.mxu3 %v2448_v55  ;;  %v2521_v23 = vld [vmem:[%s3556_s14 + $0x250] sm:$0xff]  ;;  %v2522_v24 = vld [vmem:[%s3556_s14 + $0x258] sm:$0xff]  ;;  %v2519_v25 = vld [vmem:[%s3556_s14 + $0x240] sm:$0xff] }
  0x45   : > { %321 = vmatpush.msra.mxu0 %v280_v56  ;;  %341 = vmatpush.msra.mxu1 %v281_v57  ;;  %v2520_v26 = vld [vmem:[%s3556_s14 + $0x248] sm:$0xff]  ;;  %v2517_v27 = vld [vmem:[%s3556_s14 + $0x230] sm:$0xff]  ;;  %v2518_v28 = vld [vmem:[%s3556_s14 + $0x238] sm:$0xff] }
  0x46   : > { %396 = vmatpush.msra.mxu2 %v2445_v58  ;;  %416 = vmatpush.msra.mxu3 %v2446_v59  ;;  %v2515_v29 = vld [vmem:[%s3556_s14 + $0x220] sm:$0xff]  ;;  %v2516_v30 = vld [vmem:[%s3556_s14 + $0x228] sm:$0xff]  ;;  %v2513_v31 = vld [vmem:[%s3556_s14 + $0x210] sm:$0xff] }
  0x47   : > { %397 = vmatmul.f32.vlgmr.msra.gmra.mxu2 %v3626_v60  ;;  %417 = vmatmul.f32.vlgmr.msra.gmra.mxu3 %v3626_v60  ;;  %v2514_v32 = vld [vmem:[%s3556_s14 + $0x218] sm:$0xff]  ;;  %v2511_v33 = vld [vmem:[%s3556_s14 + $0x200] sm:$0xff]  ;;  %v2512_v34 = vld [vmem:[%s3556_s14 + $0x208] sm:$0xff] }
  0x48   : > { %680 = vmatpush.msrb.mxu2 %v2541_v61  ;;  %700 = vmatpush.msrb.mxu3 %v2542_v62  ;;  %v3680_v48 = vld [vmem:[%s4879_s3] sm:$0xff]  ;;  %v3691_v49 = vld [vmem:[%s4879_s3 + $0x8] sm:$0xff]  ;;  %v3700_v50 = vld [vmem:[%s4879_s3 + $0x10] sm:$0xff] }
  0x49   : > { %322 = vmatpush.msra.mxu0 %v278_v63  ;;  %342 = vmatpush.msra.mxu1 %v279_v0  ;;  %v3709_v51 = vld [vmem:[%s4879_s3 + $0x18] sm:$0xff]  ;;  %v3726_v63 = vld [vmem:[%s4879_s3 + $0x20] sm:$0xff]  ;;  %v3741_v0 = vld [vmem:[%s4879_s3 + $0x28] sm:$0xff] }
  0x4a   : > { %681 = vmatpush.msrb.mxu2 %v2539_v1  ;;  %701 = vmatpush.msrb.mxu3 %v2540_v2  ;;  %v3754_v1 = vld [vmem:[%s4879_s3 + $0x30] sm:$0xff]  ;;  %v3767_v2 = vld [vmem:[%s4879_s3 + $0x38] sm:$0xff] }
  0x4b   : > { %323 = vmatpush.msra.mxu0 %v276_v3  ;;  %343 = vmatpush.msra.mxu1 %v277_v4  ;;  %v3780_v3 = vld [vmem:[%s4879_s3 + $0x40] sm:$0xff]  ;;  %v2639_v4 = vld [vmem:[%s3556_s14 + $0x3f0] sm:$0xff] }
  0x4c   : > { %682 = vmatpush.msrb.mxu2 %v2537_v5  ;;  %702 = vmatpush.msrb.mxu3 %v2538_v6  ;;  %v2640_v5 = vld [vmem:[%s3556_s14 + $0x3f8] sm:$0xff]  ;;  %v2637_v6 = vld [vmem:[%s3556_s14 + $0x3e0] sm:$0xff] }
  0x4d   : > { %324 = vmatmul.f32.vlgmr.msra.gmra.mxu0 %v3626_v60  ;;  %344 = vmatmul.f32.vlgmr.msra.gmra.mxu1 %v3626_v60 }
  0x4e   : > { %683 = vmatpush.msrb.mxu2 %v2535_v7  ;;  %703 = vmatpush.msrb.mxu3 %v2536_v8  ;;  %v2638_v7 = vld [vmem:[%s3556_s14 + $0x3e8] sm:$0xff]  ;;  %v2635_v8 = vld [vmem:[%s3556_s14 + $0x3d0] sm:$0xff] }
  0x4f   : > { %3252 = vset.pattern.permute.xlu0 %v3421_v14  ;;  %v2632_v14 = vld [vmem:[%s3556_s14 + $0x3b8] sm:$0xff] }
  0x50   : > { %684 = vmatpush.msrb.mxu2 %v2533_v9  ;;  %704 = vmatpush.msrb.mxu3 %v2534_v10  ;;  %v2636_v9 = vld [vmem:[%s3556_s14 + $0x3d8] sm:$0xff]  ;;  %v3799_v10 = vld [vmem:[%s4879_s3 + $0x48] sm:$0xff] }
  0x51   : > { %273 = vperm.xlu0 %3252, %v270_v11   ;;  %v2633_v11 = vld [vmem:[%s3556_s14 + $0x3c0] sm:$0xff] }
  0x52   : > { %685 = vmatpush.msrb.mxu2 %v2531_v12  ;;  %705 = vmatpush.msrb.mxu3 %v2532_v13  ;;  %v2634_v12 = vld [vmem:[%s3556_s14 + $0x3c8] sm:$0xff]  ;;  %v2631_v13 = vld [vmem:[%s3556_s14 + $0x3b0] sm:$0xff] }
  0x54   : > { %686 = vmatpush.msrb.mxu2 %v2529_v15  ;;  %706 = vmatpush.msrb.mxu3 %v2530_v16  ;;  %v2629_v15 = vld [vmem:[%s3556_s14 + $0x3a0] sm:$0xff]  ;;  %v2630_v16 = vld [vmem:[%s3556_s14 + $0x3a8] sm:$0xff] }
  0x56   : > { %687 = vmatpush.msrb.mxu2 %v2527_v17  ;;  %707 = vmatpush.msrb.mxu3 %v2528_v18  ;;  %v3818_v17 = vld [vmem:[%s4879_s3 + $0x50] sm:$0xff] }
  0x57   : > { %v2627_v18 = vld [vmem:[%s3556_s14 + $0x390] sm:$0xff] }
  0x58   : > { %688 = vmatpush.msrb.mxu2 %v2525_v19  ;;  %708 = vmatpush.msrb.mxu3 %v2526_v20  ;;  %v2628_v19 = vld [vmem:[%s3556_s14 + $0x398] sm:$0xff]  ;;  %v2625_v20 = vld [vmem:[%s3556_s14 + $0x380] sm:$0xff] }
  0x5a   : > { %689 = vmatpush.msrb.mxu2 %v2523_v21  ;;  %709 = vmatpush.msrb.mxu3 %v2524_v22  ;;  %v2626_v21 = vld [vmem:[%s3556_s14 + $0x388] sm:$0xff]  ;;  %v2623_v22 = vld [vmem:[%s3556_s14 + $0x370] sm:$0xff] }
  0x5c   : > { %690 = vmatpush.msrb.mxu2 %v2521_v23  ;;  %710 = vmatpush.msrb.mxu3 %v2522_v24  ;;  %v2624_v23 = vld [vmem:[%s3556_s14 + $0x378] sm:$0xff] }
  0x5d   : > { %v3837_v24 = vld [vmem:[%s4879_s3 + $0x58] sm:$0xff] }
  0x5e   : > { %691 = vmatpush.msrb.mxu2 %v2519_v25  ;;  %711 = vmatpush.msrb.mxu3 %v2520_v26  ;;  %v2621_v25 = vld [vmem:[%s3556_s14 + $0x360] sm:$0xff]  ;;  %v2622_v26 = vld [vmem:[%s3556_s14 + $0x368] sm:$0xff] }
  0x60   : > { %692 = vmatpush.msrb.mxu2 %v2517_v27  ;;  %712 = vmatpush.msrb.mxu3 %v2518_v28  ;;  %v2619_v27 = vld [vmem:[%s3556_s14 + $0x350] sm:$0xff]  ;;  %v2620_v28 = vld [vmem:[%s3556_s14 + $0x358] sm:$0xff] }
  0x62   : > { %693 = vmatpush.msrb.mxu2 %v2515_v29  ;;  %713 = vmatpush.msrb.mxu3 %v2516_v30  ;;  %v2617_v29 = vld [vmem:[%s3556_s14 + $0x340] sm:$0xff]  ;;  %v2618_v30 = vld [vmem:[%s3556_s14 + $0x348] sm:$0xff] }
  0x64   : > { %694 = vmatpush.msrb.mxu2 %v2513_v31  ;;  %714 = vmatpush.msrb.mxu3 %v2514_v32  ;;  %v3856_v31 = vld [vmem:[%s4879_s3 + $0x60] sm:$0xff]  ;;  %v2615_v32 = vld [vmem:[%s3556_s14 + $0x330] sm:$0xff] }
  0x66   : > { %695 = vmatpush.msrb.mxu2 %v2511_v33  ;;  %715 = vmatpush.msrb.mxu3 %v2512_v34  ;;  %v2616_v33 = vld [vmem:[%s3556_s14 + $0x338] sm:$0xff]  ;;  %v2613_v34 = vld [vmem:[%s3556_s14 + $0x320] sm:$0xff] }
  0x67   : > { %696 = vmatmul.f32.vlgmr.msrb.gmra.mxu2 %v3626_v60  ;;  %716 = vmatmul.f32.vlgmr.msrb.gmra.mxu3 %v3626_v60 }
  0xc3   : > { %v3673_v43 = vpop.permute.xlu0 %273 }
  0xca   : > { %v325_v35 = vpop.f32.mrf.mxu0  ;;  %v345_v36 = vpop.f32.mrf.mxu1 }
  0xcb   : > { %v421_v37 = vmul.f32 0.6666667, %v325_v35  ;;  %v422_v38 = vmul.f32 0.6666667, %v345_v36  ;;  %v398_v39 = vpop.f32.mrf.mxu2  ;;  %v418_v40 = vpop.f32.mrf.mxu3  ;;  %v2614_v35 = vld [vmem:[%s3556_s14 + $0x328] sm:$0xff]  ;;  %v2737_v36 = vld [vmem:[%s3556_s14 + $0x4f0] sm:$0xff] }
  0xcc   : > { %v423_v41 = vmul.f32 0.33333334, %v398_v39  ;;  %v424_v42 = vmul.f32 0.33333334, %v418_v40  ;;  %v720_v52 = vmul.f32 0.6666667, %v398_v39 }
  0xcd   : > { %v721_v55 = vmul.f32 0.6666667, %v418_v40  ;;  %v2736_v39 = vld [vmem:[%s3556_s14 + $0x4e8] sm:$0xff]  ;;  %v2611_v40 = vld [vmem:[%s3556_s14 + $0x310] sm:$0xff] }
  0xce   : > { %v425_v44 = vadd.f32 %v423_v41, %v421_v37  ;;  %v426_v45 = vadd.f32 %v424_v42, %v422_v38  ;;  %v2738_v37 = vld [vmem:[%s3556_s14 + $0x4f8] sm:$0xff]  ;;  %v2735_v38 = vld [vmem:[%s3556_s14 + $0x4e0] sm:$0xff]  ;;  %v2733_v42 = vld [vmem:[%s3556_s14 + $0x4d0] sm:$0xff] }
  0xcf   : > { %v2612_v41 = vld [vmem:[%s3556_s14 + $0x318] sm:$0xff] }
  0xd0   : > { %v427_v46 = vadd.f32 %v425_v44, %v3673_v43  ;;  %v428_v47 = vadd.f32 %v426_v45, %v3673_v43  ;;  %v2734_v44 = vld [vmem:[%s3556_s14 + $0x4d8] sm:$0xff]  ;;  %v3881_v45 = vld [vmem:[%s4879_s3 + $0x68] sm:$0xff] }
  0xd2   : > { %2477 = vmatpush.msk.msrb.mxu0 %vm478_vm0, %v427_v46  ;;  %2494 = vmatpush.msk.msrb.mxu1 %vm478_vm0, %v428_v47  ;;  %v2609_v46 = vld [vmem:[%s3556_s14 + $0x300] sm:$0xff]  ;;  %v2610_v47 = vld [vmem:[%s3556_s14 + $0x308] sm:$0xff] }
  0xd3   : > { %2478 = vmatmul.msk.f32.vlgmr.msrb.gmra.mxu0 %vm429_vm1, %v3680_v48  ;;  %2495 = vmatmul.msk.f32.vlgmr.msrb.gmra.mxu1 %vm429_vm1, %v3680_v48 }
  0xd4   : > { %930 = vmatpush.msra.mxu0 %v2639_v4  ;;  %950 = vmatpush.msra.mxu1 %v2640_v5  ;;  %v2726_v4 = vld [vmem:[%s3556_s14 + $0x498] sm:$0xff]  ;;  %v2723_v5 = vld [vmem:[%s3556_s14 + $0x480] sm:$0xff] }
  0xd6   : > { %931 = vmatpush.msra.mxu0 %v2637_v6  ;;  %951 = vmatpush.msra.mxu1 %v2638_v7  ;;  %v2724_v6 = vld [vmem:[%s3556_s14 + $0x488] sm:$0xff]  ;;  %v2721_v7 = vld [vmem:[%s3556_s14 + $0x470] sm:$0xff] }
  0xd8   : > { %932 = vmatpush.msra.mxu0 %v2635_v8  ;;  %952 = vmatpush.msra.mxu1 %v2636_v9  ;;  %v2722_v8 = vld [vmem:[%s3556_s14 + $0x478] sm:$0xff] }
  0xd9   : > { %v3921_v9 = vld [vmem:[%s4879_s3 + $0x78] sm:$0xff] }
  0xda   : > { %933 = vmatpush.msra.mxu0 %v2633_v11  ;;  %953 = vmatpush.msra.mxu1 %v2634_v12  ;;  %v2719_v11 = vld [vmem:[%s3556_s14 + $0x460] sm:$0xff]  ;;  %v2720_v12 = vld [vmem:[%s3556_s14 + $0x468] sm:$0xff] }
  0xdb   : > { %2479 = vmatmul.msk.f32.gmra.mxu0 %vm429_vm1, %v3691_v49  ;;  %2496 = vmatmul.msk.f32.gmra.mxu1 %vm429_vm1, %v3691_v49 }
  0xdc   : > { %934 = vmatpush.msra.mxu0 %v2631_v13  ;;  %954 = vmatpush.msra.mxu1 %v2632_v14  ;;  %v2717_v13 = vld [vmem:[%s3556_s14 + $0x450] sm:$0xff]  ;;  %v2718_v14 = vld [vmem:[%s3556_s14 + $0x458] sm:$0xff] }
  0xde   : > { %935 = vmatpush.msra.mxu0 %v2629_v15  ;;  %955 = vmatpush.msra.mxu1 %v2630_v16  ;;  %v2715_v15 = vld [vmem:[%s3556_s14 + $0x440] sm:$0xff]  ;;  %v2716_v16 = vld [vmem:[%s3556_s14 + $0x448] sm:$0xff] }
  0xe0   : > { %936 = vmatpush.msra.mxu0 %v2627_v18  ;;  %956 = vmatpush.msra.mxu1 %v2628_v19 }
  0xe2   : > { %937 = vmatpush.msra.mxu0 %v2625_v20  ;;  %957 = vmatpush.msra.mxu1 %v2626_v21  ;;  %v2713_v20 = vld [vmem:[%s3556_s14 + $0x430] sm:$0xff]  ;;  %v2714_v21 = vld [vmem:[%s3556_s14 + $0x438] sm:$0xff] }
  0xe3   : > { %2480 = vmatmul.msk.f32.gmra.mxu0 %vm429_vm1, %v3700_v50  ;;  %2497 = vmatmul.msk.f32.gmra.mxu1 %vm429_vm1, %v3700_v50 }
  0xe4   : > { %938 = vmatpush.msra.mxu0 %v2623_v22  ;;  %958 = vmatpush.msra.mxu1 %v2624_v23  ;;  %v2711_v22 = vld [vmem:[%s3556_s14 + $0x420] sm:$0xff]  ;;  %v2712_v23 = vld [vmem:[%s3556_s14 + $0x428] sm:$0xff] }
  0xe6   : > { %939 = vmatpush.msra.mxu0 %v2621_v25  ;;  %959 = vmatpush.msra.mxu1 %v2622_v26  ;;  %v2709_v25 = vld [vmem:[%s3556_s14 + $0x410] sm:$0xff]  ;;  %v2710_v26 = vld [vmem:[%s3556_s14 + $0x418] sm:$0xff] }
  0xe8   : > { %940 = vmatpush.msra.mxu0 %v2619_v27  ;;  %960 = vmatpush.msra.mxu1 %v2620_v28 }
  0xea   : > { %v3711_v53 = vpop.f32.mrf.mxu2  ;;  %v3713_v54 = vpop.f32.mrf.mxu3  ;;  %941 = vmatpush.msra.mxu0 %v2617_v29  ;;  %961 = vmatpush.msra.mxu1 %v2618_v30  ;;  %v2707_v29 = vld [vmem:[%s3556_s14 + $0x400] sm:$0xff]  ;;  %v2708_v30 = vld [vmem:[%s3556_s14 + $0x408] sm:$0xff] }
  0xeb   : > { %v722_v56 = vmul.f32 0.33333334, %v3711_v53  ;;  %v723_v57 = vmul.f32 0.33333334, %v3713_v54  ;;  %2481 = vmatmul.msk.f32.gmra.mxu0 %vm429_vm1, %v3709_v51  ;;  %2498 = vmatmul.msk.f32.gmra.mxu1 %vm429_vm1, %v3709_v51 }
  0xec   : > { %942 = vmatpush.msra.mxu0 %v2615_v32  ;;  %962 = vmatpush.msra.mxu1 %v2616_v33 }
  0xed   : > { %v724_v58 = vadd.f32 %v722_v56, %v720_v52  ;;  %v725_v59 = vadd.f32 %v723_v57, %v721_v55  ;;  %v2731_v52 = vld [vmem:[%s3556_s14 + $0x4c0] sm:$0xff]  ;;  %v2732_v55 = vld [vmem:[%s3556_s14 + $0x4c8] sm:$0xff]  ;;  %v2729_v56 = vld [vmem:[%s3556_s14 + $0x4b0] sm:$0xff] }
  0xee   : > { %943 = vmatpush.msra.mxu0 %v2613_v34  ;;  %963 = vmatpush.msra.mxu1 %v2614_v35  ;;  %v2730_v57 = vld [vmem:[%s3556_s14 + $0x4b8] sm:$0xff] }
  0xef   : > { %v726_v61 = vadd.f32 %v724_v58, %v3673_v43  ;;  %v727_v62 = vadd.f32 %v725_v59, %v3673_v43  ;;  %v2727_v58 = vld [vmem:[%s3556_s14 + $0x4a0] sm:$0xff]  ;;  %v2728_v59 = vld [vmem:[%s3556_s14 + $0x4a8] sm:$0xff] }
  0xf0   : > { %944 = vmatpush.msra.mxu0 %v2611_v40  ;;  %964 = vmatpush.msra.mxu1 %v2612_v41 }
  0xf1   : > { %2543 = vmatpush.msk.msra.mxu2 %vm478_vm0, %v726_v61  ;;  %2560 = vmatpush.msk.msra.mxu3 %vm478_vm0, %v727_v62  ;;  %v3902_v61 = vld [vmem:[%s4879_s3 + $0x70] sm:$0xff] }
  0xf2   : > { %2544 = vmatmul.msk.f32.vlgmr.msra.gmra.mxu2 %vm429_vm1, %v3680_v48  ;;  %2561 = vmatmul.msk.f32.vlgmr.msra.gmra.mxu3 %vm429_vm1, %v3680_v48  ;;  %v2725_v62 = vld [vmem:[%s3556_s14 + $0x490] sm:$0xff] }
  0xf3   : > { %2482 = vmatmul.msk.f32.gmra.mxu0 %vm429_vm1, %v3726_v63  ;;  %2499 = vmatmul.msk.f32.gmra.mxu1 %vm429_vm1, %v3726_v63 }
  0xf4   : > { %1180 = vmatpush.msrb.mxu2 %v2737_v36  ;;  %1200 = vmatpush.msrb.mxu3 %v2738_v37 }
  0xf5   : > { %945 = vmatpush.msra.mxu0 %v2609_v46  ;;  %965 = vmatpush.msra.mxu1 %v2610_v47 }
  0xf6   : > { %1181 = vmatpush.msrb.mxu2 %v2735_v38  ;;  %1201 = vmatpush.msrb.mxu3 %v2736_v39 }
  0xf8   : > { %1182 = vmatpush.msrb.mxu2 %v2733_v42  ;;  %1202 = vmatpush.msrb.mxu3 %v2734_v44 }
  0xfa   : > { %2545 = vmatmul.msk.f32.gmra.mxu2 %vm429_vm1, %v3691_v49  ;;  %2562 = vmatmul.msk.f32.gmra.mxu3 %vm429_vm1, %v3691_v49 }
  0xfb   : > { %2483 = vmatmul.msk.f32.gmra.mxu0 %vm429_vm1, %v3741_v0  ;;  %2500 = vmatmul.msk.f32.gmra.mxu1 %vm429_vm1, %v3741_v0 }
  0xfc   : > { %1183 = vmatpush.msrb.mxu2 %v2731_v52  ;;  %1203 = vmatpush.msrb.mxu3 %v2732_v55 }
  0xfe   : > { %1184 = vmatpush.msrb.mxu2 %v2729_v56  ;;  %1204 = vmatpush.msrb.mxu3 %v2730_v57 }
 0x100   : > { %1185 = vmatpush.msrb.mxu2 %v2727_v58  ;;  %1205 = vmatpush.msrb.mxu3 %v2728_v59 }
 0x102   : > { %2546 = vmatmul.msk.f32.gmra.mxu2 %vm429_vm1, %v3700_v50  ;;  %2563 = vmatmul.msk.f32.gmra.mxu3 %vm429_vm1, %v3700_v50 }
 0x103   : > { %2484 = vmatmul.msk.f32.gmra.mxu0 %vm429_vm1, %v3754_v1  ;;  %2501 = vmatmul.msk.f32.gmra.mxu1 %vm429_vm1, %v3754_v1 }
 0x104   : > { %1186 = vmatpush.msrb.mxu2 %v2725_v62  ;;  %1206 = vmatpush.msrb.mxu3 %v2726_v4 }
 0x106   : > { %1187 = vmatpush.msrb.mxu2 %v2723_v5  ;;  %1207 = vmatpush.msrb.mxu3 %v2724_v6 }
 0x108   : > { %1188 = vmatpush.msrb.mxu2 %v2721_v7  ;;  %1208 = vmatpush.msrb.mxu3 %v2722_v8 }
 0x10a   : > { %2547 = vmatmul.msk.f32.gmra.mxu2 %vm429_vm1, %v3709_v51  ;;  %2564 = vmatmul.msk.f32.gmra.mxu3 %vm429_vm1, %v3709_v51 }
 0x10b   : > { %2485 = vmatmul.msk.f32.gmra.mxu0 %vm429_vm1, %v3767_v2  ;;  %2502 = vmatmul.msk.f32.gmra.mxu1 %vm429_vm1, %v3767_v2 }
 0x10c   : > { %1189 = vmatpush.msrb.mxu2 %v2719_v11  ;;  %1209 = vmatpush.msrb.mxu3 %v2720_v12 }
 0x10e   : > { %1190 = vmatpush.msrb.mxu2 %v2717_v13  ;;  %1210 = vmatpush.msrb.mxu3 %v2718_v14 }
 0x110   : > { %1191 = vmatpush.msrb.mxu2 %v2715_v15  ;;  %1211 = vmatpush.msrb.mxu3 %v2716_v16 }
 0x112   : > { %2548 = vmatmul.msk.f32.gmra.mxu2 %vm429_vm1, %v3726_v63  ;;  %2565 = vmatmul.msk.f32.gmra.mxu3 %vm429_vm1, %v3726_v63 }
 0x113   : > { %2486 = vmatmul.msk.f32.gmra.mxu0 %vm429_vm1, %v3780_v3  ;;  %2503 = vmatmul.msk.f32.gmra.mxu1 %vm429_vm1, %v3780_v3 }
 0x114   : > { %1192 = vmatpush.msrb.mxu2 %v2713_v20  ;;  %1212 = vmatpush.msrb.mxu3 %v2714_v21 }
 0x116   : > { %1193 = vmatpush.msrb.mxu2 %v2711_v22  ;;  %1213 = vmatpush.msrb.mxu3 %v2712_v23 }
 0x118   : > { %1194 = vmatpush.msrb.mxu2 %v2709_v25  ;;  %1214 = vmatpush.msrb.mxu3 %v2710_v26 }
 0x11a   : > { %2549 = vmatmul.msk.f32.gmra.mxu2 %vm429_vm1, %v3741_v0  ;;  %2566 = vmatmul.msk.f32.gmra.mxu3 %vm429_vm1, %v3741_v0 }
 0x11b   : > { %2487 = vmatmul.msk.f32.gmra.mxu0 %vm429_vm1, %v3799_v10  ;;  %2504 = vmatmul.msk.f32.gmra.mxu1 %vm429_vm1, %v3799_v10 }
 0x11c   : > { %1195 = vmatpush.msrb.mxu2 %v2707_v29  ;;  %1215 = vmatpush.msrb.mxu3 %v2708_v30 }
 0x122   : > { %2550 = vmatmul.msk.f32.gmra.mxu2 %vm429_vm1, %v3754_v1  ;;  %2567 = vmatmul.msk.f32.gmra.mxu3 %vm429_vm1, %v3754_v1 }
 0x123   : > { %2488 = vmatmul.msk.f32.gmra.mxu0 %vm429_vm1, %v3818_v17  ;;  %2505 = vmatmul.msk.f32.gmra.mxu1 %vm429_vm1, %v3818_v17 }
 0x12a   : > { %2551 = vmatmul.msk.f32.gmra.mxu2 %vm429_vm1, %v3767_v2  ;;  %2568 = vmatmul.msk.f32.gmra.mxu3 %vm429_vm1, %v3767_v2 }
 0x12b   : > { %2489 = vmatmul.msk.f32.gmra.mxu0 %vm429_vm1, %v3837_v24  ;;  %2506 = vmatmul.msk.f32.gmra.mxu1 %vm429_vm1, %v3837_v24 }
 0x132   : > { %2552 = vmatmul.msk.f32.gmra.mxu2 %vm429_vm1, %v3780_v3  ;;  %2569 = vmatmul.msk.f32.gmra.mxu3 %vm429_vm1, %v3780_v3 }
 0x133   : > { %2490 = vmatmul.msk.f32.gmra.mxu0 %vm429_vm1, %v3856_v31  ;;  %2507 = vmatmul.msk.f32.gmra.mxu1 %vm429_vm1, %v3856_v31 }
 0x13a   : > { %2553 = vmatmul.msk.f32.gmra.mxu2 %vm429_vm1, %v3799_v10  ;;  %2570 = vmatmul.msk.f32.gmra.mxu3 %vm429_vm1, %v3799_v10 }
 0x13b   : > { %2491 = vmatmul.msk.f32.gmra.mxu0 %vm429_vm1, %v3881_v45  ;;  %2508 = vmatmul.msk.f32.gmra.mxu1 %vm429_vm1, %v3881_v45 }
 0x142   : > { %2554 = vmatmul.msk.f32.gmra.mxu2 %vm429_vm1, %v3818_v17  ;;  %2571 = vmatmul.msk.f32.gmra.mxu3 %vm429_vm1, %v3818_v17 }
 0x143   : > { %2492 = vmatmul.msk.f32.gmra.mxu0 %vm429_vm1, %v3902_v61  ;;  %2509 = vmatmul.msk.f32.gmra.mxu1 %vm429_vm1, %v3902_v61 }
 0x14a   : > { %2555 = vmatmul.msk.f32.gmra.mxu2 %vm429_vm1, %v3837_v24  ;;  %2572 = vmatmul.msk.f32.gmra.mxu3 %vm429_vm1, %v3837_v24 }
 0x14b   : > { %2493 = vmatmul.msk.f32.gmra.mxu0 %vm429_vm1, %v3921_v9  ;;  %2510 = vmatmul.msk.f32.gmra.mxu1 %vm429_vm1, %v3921_v9 }
 0x150   : > { %v502_v18 = vpop.f32.mrf.mxu0  ;;  %v567_v19 = vpop.f32.mrf.mxu1 }
 0x151   : > { %615 = vst [vmem:[%s3939_s6] sm:$0xff] %v502_v18 }
 0x152   : > { %616 = vst [vmem:[%s3939_s6 + $0x8] sm:$0xff] %v567_v19  ;;  %2556 = vmatmul.msk.f32.gmra.mxu2 %vm429_vm1, %v3856_v31  ;;  %2573 = vmatmul.msk.f32.gmra.mxu3 %vm429_vm1, %v3856_v31 }
 0x153   : > { %946 = vmatmul.f32.vlgmr.msra.gmra.mxu0 %v3626_v60  ;;  %966 = vmatmul.f32.vlgmr.msra.gmra.mxu1 %v3626_v60 }
 0x158   : > { %v505_v27 = vpop.f32.mrf.mxu0  ;;  %v570_v28 = vpop.f32.mrf.mxu1 }
 0x159   : > { %617 = vst [vmem:[%s3939_s6 + $0x10] sm:$0xff] %v505_v27 }
 0x15a   : > { %618 = vst [vmem:[%s3939_s6 + $0x18] sm:$0xff] %v570_v28  ;;  %2557 = vmatmul.msk.f32.gmra.mxu2 %vm429_vm1, %v3881_v45  ;;  %2574 = vmatmul.msk.f32.gmra.mxu3 %vm429_vm1, %v3881_v45 }
 0x160   : > { %v508_v32 = vpop.f32.mrf.mxu0  ;;  %v573_v33 = vpop.f32.mrf.mxu1 }
 0x161   : > { %619 = vst [vmem:[%s3939_s6 + $0x20] sm:$0xff] %v508_v32 }
 0x162   : > { %620 = vst [vmem:[%s3939_s6 + $0x28] sm:$0xff] %v573_v33  ;;  %2558 = vmatmul.msk.f32.gmra.mxu2 %vm429_vm1, %v3902_v61  ;;  %2575 = vmatmul.msk.f32.gmra.mxu3 %vm429_vm1, %v3902_v61 }
 0x168   : > { %v511_v34 = vpop.f32.mrf.mxu0  ;;  %v576_v35 = vpop.f32.mrf.mxu1 }
 0x169   : > { %621 = vst [vmem:[%s3939_s6 + $0x30] sm:$0xff] %v511_v34 }
 0x16a   : > { %622 = vst [vmem:[%s3939_s6 + $0x38] sm:$0xff] %v576_v35  ;;  %2559 = vmatmul.msk.f32.gmra.mxu2 %vm429_vm1, %v3921_v9  ;;  %2576 = vmatmul.msk.f32.gmra.mxu3 %vm429_vm1, %v3921_v9 }
 0x170   : > { %v514_v36 = vpop.f32.mrf.mxu0  ;;  %v579_v37 = vpop.f32.mrf.mxu1 }
 0x171   : > { %623 = vst [vmem:[%s3939_s6 + $0x40] sm:$0xff] %v514_v36 }
 0x172   : > { %624 = vst [vmem:[%s3939_s6 + $0x48] sm:$0xff] %v579_v37  ;;  %1196 = vmatmul.f32.vlgmr.msrb.gmra.mxu2 %v3626_v60  ;;  %1216 = vmatmul.f32.vlgmr.msrb.gmra.mxu3 %v3626_v60 }
 0x175   : > { %v751_v38 = vpop.f32.mrf.mxu2  ;;  %v816_v39 = vpop.f32.mrf.mxu3 }
 0x176   : > { %2577 = vst [vmem:[%s3939_s6 + $0x100] sm:$0xff] %v751_v38 }
 0x177   : > { %2578 = vst [vmem:[%s3939_s6 + $0x108] sm:$0xff] %v816_v39  ;;  %v970_v39 = vmul.f32 0.6666667, %v3711_v53 }
 0x178   : > { %v517_v40 = vpop.f32.mrf.mxu0  ;;  %v582_v41 = vpop.f32.mrf.mxu1 }
 0x179   : > { %625 = vst [vmem:[%s3939_s6 + $0x50] sm:$0xff] %v517_v40 }
 0x17a   : > { %626 = vst [vmem:[%s3939_s6 + $0x58] sm:$0xff] %v582_v41 }
 0x17d   : > { %v754_v42 = vpop.f32.mrf.mxu2  ;;  %v819_v44 = vpop.f32.mrf.mxu3 }
 0x17e   : > { %2579 = vst [vmem:[%s3939_s6 + $0x110] sm:$0xff] %v754_v42  ;;  %v971_v42 = vmul.f32 0.6666667, %v3713_v54 }
 0x17f   : > { %2580 = vst [vmem:[%s3939_s6 + $0x118] sm:$0xff] %v819_v44 }
 0x180   : > { %v520_v60 = vpop.f32.mrf.mxu0  ;;  %v585_v46 = vpop.f32.mrf.mxu1 }
 0x181   : > { %627 = vst [vmem:[%s3939_s6 + $0x60] sm:$0xff] %v520_v60 }
 0x182   : > { %628 = vst [vmem:[%s3939_s6 + $0x68] sm:$0xff] %v585_v46 }
 0x185   : > { %v757_v47 = vpop.f32.mrf.mxu2  ;;  %v822_v52 = vpop.f32.mrf.mxu3 }
 0x186   : > { %2581 = vst [vmem:[%s3939_s6 + $0x120] sm:$0xff] %v757_v47 }
 0x187   : > { %2582 = vst [vmem:[%s3939_s6 + $0x128] sm:$0xff] %v822_v52 }
 0x188   : > { %v523_v55 = vpop.f32.mrf.mxu0  ;;  %v588_v56 = vpop.f32.mrf.mxu1 }
 0x189   : > { %629 = vst [vmem:[%s3939_s6 + $0x70] sm:$0xff] %v523_v55 }
 0x18a   : > { %630 = vst [vmem:[%s3939_s6 + $0x78] sm:$0xff] %v588_v56 }
 0x18d   : > { %v760_v57 = vpop.f32.mrf.mxu2  ;;  %v825_v58 = vpop.f32.mrf.mxu3 }
 0x18e   : > { %2583 = vst [vmem:[%s3939_s6 + $0x130] sm:$0xff] %v760_v57 }
 0x18f   : > { %2584 = vst [vmem:[%s3939_s6 + $0x138] sm:$0xff] %v825_v58 }
 0x190   : > { %v526_v59 = vpop.f32.mrf.mxu0  ;;  %v591_v62 = vpop.f32.mrf.mxu1 }
 0x191   : > { %631 = vst [vmem:[%s3939_s6 + $0x80] sm:$0xff] %v526_v59 }
 0x192   : > { %632 = vst [vmem:[%s3939_s6 + $0x88] sm:$0xff] %v591_v62 }
 0x195   : > { %v763_v4 = vpop.f32.mrf.mxu2  ;;  %v828_v5 = vpop.f32.mrf.mxu3 }
 0x196   : > { %2585 = vst [vmem:[%s3939_s6 + $0x140] sm:$0xff] %v763_v4 }
 0x197   : > { %2586 = vst [vmem:[%s3939_s6 + $0x148] sm:$0xff] %v828_v5 }
 0x198   : > { %v529_v6 = vpop.f32.mrf.mxu0  ;;  %v594_v7 = vpop.f32.mrf.mxu1 }
 0x199   : > { %633 = vst [vmem:[%s3939_s6 + $0x90] sm:$0xff] %v529_v6 }
 0x19a   : > { %634 = vst [vmem:[%s3939_s6 + $0x98] sm:$0xff] %v594_v7 }
 0x19d   : > { %v766_v8 = vpop.f32.mrf.mxu2  ;;  %v831_v11 = vpop.f32.mrf.mxu3 }
 0x19e   : > { %2587 = vst [vmem:[%s3939_s6 + $0x150] sm:$0xff] %v766_v8 }
 0x19f   : > { %2588 = vst [vmem:[%s3939_s6 + $0x158] sm:$0xff] %v831_v11 }
 0x1a0   : > { %v532_v12 = vpop.f32.mrf.mxu0  ;;  %v597_v13 = vpop.f32.mrf.mxu1 }
 0x1a1   : > { %635 = vst [vmem:[%s3939_s6 + $0xa0] sm:$0xff] %v532_v12 }
 0x1a2   : > { %636 = vst [vmem:[%s3939_s6 + $0xa8] sm:$0xff] %v597_v13 }
 0x1a5   : > { %v769_v14 = vpop.f32.mrf.mxu2  ;;  %v834_v15 = vpop.f32.mrf.mxu3 }
 0x1a6   : > { %2589 = vst [vmem:[%s3939_s6 + $0x160] sm:$0xff] %v769_v14 }
 0x1a7   : > { %2590 = vst [vmem:[%s3939_s6 + $0x168] sm:$0xff] %v834_v15 }
 0x1a8   : > { %v535_v16 = vpop.f32.mrf.mxu0  ;;  %v600_v18 = vpop.f32.mrf.mxu1 }
 0x1a9   : > { %637 = vst [vmem:[%s3939_s6 + $0xb0] sm:$0xff] %v535_v16 }
 0x1aa   : > { %638 = vst [vmem:[%s3939_s6 + $0xb8] sm:$0xff] %v600_v18  ;;  %v2834_v18 = vld [vmem:[%s3556_s14 + $0x5e8] sm:$0xff] }
 0x1ad   : > { %v772_v19 = vpop.f32.mrf.mxu2  ;;  %v837_v20 = vpop.f32.mrf.mxu3 }
 0x1ae   : > { %2591 = vst [vmem:[%s3939_s6 + $0x170] sm:$0xff] %v772_v19  ;;  %v2832_v19 = vld [vmem:[%s3556_s14 + $0x5d8] sm:$0xff] }
 0x1af   : > { %2592 = vst [vmem:[%s3939_s6 + $0x178] sm:$0xff] %v837_v20  ;;  %v2829_v20 = vld [vmem:[%s3556_s14 + $0x5c0] sm:$0xff] }
 0x1b0   : > { %v538_v21 = vpop.f32.mrf.mxu0  ;;  %v603_v22 = vpop.f32.mrf.mxu1 }
 0x1b1   : > { %639 = vst [vmem:[%s3939_s6 + $0xc0] sm:$0xff] %v538_v21  ;;  %v2830_v21 = vld [vmem:[%s3556_s14 + $0x5c8] sm:$0xff] }
 0x1b2   : > { %640 = vst [vmem:[%s3939_s6 + $0xc8] sm:$0xff] %v603_v22  ;;  %v2827_v22 = vld [vmem:[%s3556_s14 + $0x5b0] sm:$0xff] }
 0x1b5   : > { %v775_v23 = vpop.f32.mrf.mxu2  ;;  %v840_v25 = vpop.f32.mrf.mxu3 }
 0x1b6   : > { %2593 = vst [vmem:[%s3939_s6 + $0x180] sm:$0xff] %v775_v23  ;;  %v2828_v23 = vld [vmem:[%s3556_s14 + $0x5b8] sm:$0xff] }
 0x1b7   : > { %2594 = vst [vmem:[%s3939_s6 + $0x188] sm:$0xff] %v840_v25  ;;  %v2826_v25 = vld [vmem:[%s3556_s14 + $0x5a8] sm:$0xff] }
 0x1b8   : > { %v541_v26 = vpop.f32.mrf.mxu0  ;;  %v606_v27 = vpop.f32.mrf.mxu1 }
 0x1b9   : > { %641 = vst [vmem:[%s3939_s6 + $0xd0] sm:$0xff] %v541_v26  ;;  %v2823_v26 = vld [vmem:[%s3556_s14 + $0x590] sm:$0xff] }
 0x1ba   : > { %642 = vst [vmem:[%s3939_s6 + $0xd8] sm:$0xff] %v606_v27  ;;  %v2824_v27 = vld [vmem:[%s3556_s14 + $0x598] sm:$0xff] }
 0x1bd   : > { %v778_v28 = vpop.f32.mrf.mxu2  ;;  %v843_v29 = vpop.f32.mrf.mxu3 }
 0x1be   : > { %2595 = vst [vmem:[%s3939_s6 + $0x190] sm:$0xff] %v778_v28  ;;  %v2821_v28 = vld [vmem:[%s3556_s14 + $0x580] sm:$0xff] }
 0x1bf   : > { %2596 = vst [vmem:[%s3939_s6 + $0x198] sm:$0xff] %v843_v29  ;;  %v2822_v29 = vld [vmem:[%s3556_s14 + $0x588] sm:$0xff] }
 0x1c0   : > { %v544_v30 = vpop.f32.mrf.mxu0  ;;  %v609_v32 = vpop.f32.mrf.mxu1 }
 0x1c1   : > { %643 = vst [vmem:[%s3939_s6 + $0xe0] sm:$0xff] %v544_v30  ;;  %v2820_v30 = vld [vmem:[%s3556_s14 + $0x578] sm:$0xff] }
 0x1c2   : > { %644 = vst [vmem:[%s3939_s6 + $0xe8] sm:$0xff] %v609_v32  ;;  %v2817_v32 = vld [vmem:[%s3556_s14 + $0x560] sm:$0xff] }
 0x1c5   : > { %v781_v33 = vpop.f32.mrf.mxu2  ;;  %v846_v34 = vpop.f32.mrf.mxu3 }
 0x1c6   : > { %2597 = vst [vmem:[%s3939_s6 + $0x1a0] sm:$0xff] %v781_v33  ;;  %v2818_v33 = vld [vmem:[%s3556_s14 + $0x568] sm:$0xff] }
 0x1c7   : > { %2598 = vst [vmem:[%s3939_s6 + $0x1a8] sm:$0xff] %v846_v34  ;;  %v2815_v34 = vld [vmem:[%s3556_s14 + $0x550] sm:$0xff] }
 0x1c8   : > { %v547_v35 = vpop.f32.mrf.mxu0  ;;  %v612_v36 = vpop.f32.mrf.mxu1 }
 0x1c9   : > { %645 = vst [vmem:[%s3939_s6 + $0xf0] sm:$0xff] %v547_v35  ;;  %v2816_v35 = vld [vmem:[%s3556_s14 + $0x558] sm:$0xff] }
 0x1ca   : > { %646 = vst [vmem:[%s3939_s6 + $0xf8] sm:$0xff] %v612_v36  ;;  %v2814_v36 = vld [vmem:[%s3556_s14 + $0x548] sm:$0xff] }
 0x1cd   : > { %v784_v37 = vpop.f32.mrf.mxu2  ;;  %v849_v38 = vpop.f32.mrf.mxu3 }
 0x1ce   : > { %2599 = vst [vmem:[%s3939_s6 + $0x1b0] sm:$0xff] %v784_v37  ;;  %v2811_v37 = vld [vmem:[%s3556_s14 + $0x530] sm:$0xff] }
 0x1cf   : > { %2600 = vst [vmem:[%s3939_s6 + $0x1b8] sm:$0xff] %v849_v38  ;;  %v2812_v38 = vld [vmem:[%s3556_s14 + $0x538] sm:$0xff] }
 0x1d0   : > { %v947_v40 = vpop.f32.mrf.mxu0  ;;  %v967_v41 = vpop.f32.mrf.mxu1 }
 0x1d1   : > { %v972_v44 = vmul.f32 0.33333334, %v947_v40  ;;  %v973_v60 = vmul.f32 0.33333334, %v967_v41  ;;  %v1220_v5 = vmul.f32 0.6666667, %v947_v40 }
 0x1d2   : > { %v1221_v8 = vmul.f32 0.6666667, %v967_v41  ;;  %v2810_v40 = vld [vmem:[%s3556_s14 + $0x528] sm:$0xff]  ;;  %v2808_v41 = vld [vmem:[%s3556_s14 + $0x518] sm:$0xff] }
 0x1d3   : > { %v974_v46 = vadd.f32 %v972_v44, %v970_v39  ;;  %v975_v47 = vadd.f32 %v973_v60, %v971_v42  ;;  %v2809_v39 = vld [vmem:[%s3556_s14 + $0x520] sm:$0xff]  ;;  %v2806_v44 = vld [vmem:[%s3556_s14 + $0x508] sm:$0xff]  ;;  %v2933_v60 = vld [vmem:[%s3556_s14 + $0x6f0] sm:$0xff] }
 0x1d4   : > { %v2805_v42 = vld [vmem:[%s3556_s14 + $0x500] sm:$0xff] }
 0x1d5   : > { %v976_v52 = vadd.f32 %v974_v46, %v3673_v43  ;;  %v977_v55 = vadd.f32 %v975_v47, %v3673_v43  ;;  %v787_v56 = vpop.f32.mrf.mxu2  ;;  %v852_v57 = vpop.f32.mrf.mxu3  ;;  %v2934_v46 = vld [vmem:[%s3556_s14 + $0x6f8] sm:$0xff]  ;;  %v2931_v47 = vld [vmem:[%s3556_s14 + $0x6e0] sm:$0xff] }
 0x1d6   : > { %2601 = vst [vmem:[%s3939_s6 + $0x1c0] sm:$0xff] %v787_v56  ;;  %v2927_v56 = vld [vmem:[%s3556_s14 + $0x6c0] sm:$0xff] }
 0x1d7   : > { %2602 = vst [vmem:[%s3939_s6 + $0x1c8] sm:$0xff] %v852_v57  ;;  %2641 = vmatpush.msk.msrb.mxu0 %vm478_vm0, %v976_v52  ;;  %2658 = vmatpush.msk.msrb.mxu1 %vm478_vm0, %v977_v55  ;;  %v2932_v52 = vld [vmem:[%s3556_s14 + $0x6e8] sm:$0xff]  ;;  %v2930_v55 = vld [vmem:[%s3556_s14 + $0x6d8] sm:$0xff] }
 0x1d8   : > { %2642 = vmatmul.msk.f32.vlgmr.msrb.gmra.mxu0 %vm429_vm1, %v3680_v48  ;;  %2659 = vmatmul.msk.f32.vlgmr.msrb.gmra.mxu1 %vm429_vm1, %v3680_v48  ;;  %v2928_v57 = vld [vmem:[%s3556_s14 + $0x6c8] sm:$0xff] }
 0x1dd   : > { %v790_v53 = vpop.f32.mrf.mxu2  ;;  %v855_v54 = vpop.f32.mrf.mxu3 }
 0x1de   : > { %2603 = vst [vmem:[%s3939_s6 + $0x1d0] sm:$0xff] %v790_v53  ;;  %v2925_v53 = vld [vmem:[%s3556_s14 + $0x6b0] sm:$0xff] }
 0x1df   : > { %2604 = vst [vmem:[%s3939_s6 + $0x1d8] sm:$0xff] %v855_v54  ;;  %v2926_v54 = vld [vmem:[%s3556_s14 + $0x6b8] sm:$0xff] }
 0x1e0   : > { %2643 = vmatmul.msk.f32.gmra.mxu0 %vm429_vm1, %v3691_v49  ;;  %2660 = vmatmul.msk.f32.gmra.mxu1 %vm429_vm1, %v3691_v49 }
 0x1e5   : > { %v793_v58 = vpop.f32.mrf.mxu2  ;;  %v858_v59 = vpop.f32.mrf.mxu3 }
 0x1e6   : > { %2605 = vst [vmem:[%s3939_s6 + $0x1e0] sm:$0xff] %v793_v58  ;;  %v2923_v58 = vld [vmem:[%s3556_s14 + $0x6a0] sm:$0xff] }
 0x1e7   : > { %2606 = vst [vmem:[%s3939_s6 + $0x1e8] sm:$0xff] %v858_v59  ;;  %v2924_v59 = vld [vmem:[%s3556_s14 + $0x6a8] sm:$0xff] }
 0x1e8   : > { %2644 = vmatmul.msk.f32.gmra.mxu0 %vm429_vm1, %v3700_v50  ;;  %2661 = vmatmul.msk.f32.gmra.mxu1 %vm429_vm1, %v3700_v50 }
 0x1ed   : > { %v796_v62 = vpop.f32.mrf.mxu2  ;;  %v861_v4 = vpop.f32.mrf.mxu3 }
 0x1ee   : > { %2607 = vst [vmem:[%s3939_s6 + $0x1f0] sm:$0xff] %v796_v62  ;;  %v2922_v62 = vld [vmem:[%s3556_s14 + $0x698] sm:$0xff] }
 0x1ef   : > { %2608 = vst [vmem:[%s3939_s6 + $0x1f8] sm:$0xff] %v861_v4  ;;  %v2919_v4 = vld [vmem:[%s3556_s14 + $0x680] sm:$0xff] }
 0x1f0   : > { %2645 = vmatmul.msk.f32.gmra.mxu0 %vm429_vm1, %v3709_v51  ;;  %2662 = vmatmul.msk.f32.gmra.mxu1 %vm429_vm1, %v3709_v51 }
 0x1f5   : > { %v4055_v6 = vpop.f32.mrf.mxu2  ;;  %v4057_v7 = vpop.f32.mrf.mxu3 }
 0x1f6   : > { %v1222_v11 = vmul.f32 0.33333334, %v4055_v6  ;;  %v1223_v12 = vmul.f32 0.33333334, %v4057_v7 }
 0x1f8   : > { %v1224_v13 = vadd.f32 %v1222_v11, %v1220_v5  ;;  %v1225_v14 = vadd.f32 %v1223_v12, %v1221_v8  ;;  %2646 = vmatmul.msk.f32.gmra.mxu0 %vm429_vm1, %v3726_v63  ;;  %2663 = vmatmul.msk.f32.gmra.mxu1 %vm429_vm1, %v3726_v63  ;;  %v2920_v5 = vld [vmem:[%s3556_s14 + $0x688] sm:$0xff]  ;;  %v2917_v8 = vld [vmem:[%s3556_s14 + $0x670] sm:$0xff]  ;;  %v2918_v11 = vld [vmem:[%s3556_s14 + $0x678] sm:$0xff] }
 0x1f9   : > { %v2916_v12 = vld [vmem:[%s3556_s14 + $0x668] sm:$0xff] }
 0x1fa   : > { %v1226_v15 = vadd.f32 %v1224_v13, %v3673_v43  ;;  %v1227_v16 = vadd.f32 %v1225_v14, %v3673_v43 }
 0x1fc   : > { %2739 = vmatpush.msk.msra.mxu2 %vm478_vm0, %v1226_v15  ;;  %2756 = vmatpush.msk.msra.mxu3 %vm478_vm0, %v1227_v16  ;;  %v2913_v15 = vld [vmem:[%s3556_s14 + $0x650] sm:$0xff]  ;;  %v2914_v16 = vld [vmem:[%s3556_s14 + $0x658] sm:$0xff] }
 0x1fd   : > { %2740 = vmatmul.msk.f32.vlgmr.msra.gmra.mxu2 %vm429_vm1, %v3680_v48  ;;  %2757 = vmatmul.msk.f32.vlgmr.msra.gmra.mxu3 %vm429_vm1, %v3680_v48  ;;  %v2835_v48 = vld [vmem:[%s3556_s14 + $0x5f0] sm:$0xff] }
 0x1fe   : > { %1430 = vmatpush.msra.mxu0 %v2835_v48  ;;  %1680 = vmatpush.msrb.mxu2 %v2933_v60  ;;  %v4217_v48 = vld [vmem:[#allocation5] sm:$0x3] }
 0x1ff   : > { %1700 = vmatpush.msrb.mxu3 %v2934_v46 }
 0x200   : > { %2647 = vmatmul.msk.f32.gmra.mxu0 %vm429_vm1, %v3741_v0  ;;  %2664 = vmatmul.msk.f32.gmra.mxu1 %vm429_vm1, %v3741_v0 }
 0x201   : > { %1681 = vmatpush.msrb.mxu2 %v2931_v47  ;;  %1701 = vmatpush.msrb.mxu3 %v2932_v52 }
 0x203   : > { %1702 = vmatpush.msrb.mxu3 %v2930_v55 }
 0x205   : > { %2741 = vmatmul.msk.f32.gmra.mxu2 %vm429_vm1, %v3691_v49  ;;  %2758 = vmatmul.msk.f32.gmra.mxu3 %vm429_vm1, %v3691_v49  ;;  %v2836_v49 = vld [vmem:[%s3556_s14 + $0x5f8] sm:$0xff] }
 0x206   : > { %1450 = vmatpush.msra.mxu1 %v2836_v49  ;;  %1703 = vmatpush.msrb.mxu3 %v2928_v57  ;;  %v2911_v49 = vld [vmem:[%s3556_s14 + $0x640] sm:$0xff] }
 0x208   : > { %2648 = vmatmul.msk.f32.gmra.mxu0 %vm429_vm1, %v3754_v1  ;;  %2665 = vmatmul.msk.f32.gmra.mxu1 %vm429_vm1, %v3754_v1 }
 0x209   : > { %1451 = vmatpush.msra.mxu1 %v2834_v18  ;;  %1704 = vmatpush.msrb.mxu3 %v2926_v54  ;;  %v2910_v18 = vld [vmem:[%s3556_s14 + $0x638] sm:$0xff] }
 0x20b   : > { %1452 = vmatpush.msra.mxu1 %v2832_v19  ;;  %1705 = vmatpush.msrb.mxu3 %v2924_v59 }
 0x20d   : > { %2742 = vmatmul.msk.f32.gmra.mxu2 %vm429_vm1, %v3700_v50  ;;  %2759 = vmatmul.msk.f32.gmra.mxu3 %vm429_vm1, %v3700_v50  ;;  %v2833_v50 = vld [vmem:[%s3556_s14 + $0x5e0] sm:$0xff] }
 0x20e   : > { %1431 = vmatpush.msra.mxu0 %v2833_v50  ;;  %1453 = vmatpush.msra.mxu1 %v2830_v21  ;;  %v2912_v50 = vld [vmem:[%s3556_s14 + $0x648] sm:$0xff] }
 0x20f   : > { %1706 = vmatpush.msrb.mxu3 %v2922_v62  ;;  %v2908_v21 = vld [vmem:[%s3556_s14 + $0x628] sm:$0xff] }
 0x210   : > { %2649 = vmatmul.msk.f32.gmra.mxu0 %vm429_vm1, %v3767_v2  ;;  %2666 = vmatmul.msk.f32.gmra.mxu1 %vm429_vm1, %v3767_v2 }
 0x211   : > { %1454 = vmatpush.msra.mxu1 %v2828_v23  ;;  %1707 = vmatpush.msrb.mxu3 %v2920_v5  ;;  %v2906_v23 = vld [vmem:[%s3556_s14 + $0x618] sm:$0xff] }
 0x213   : > { %1455 = vmatpush.msra.mxu1 %v2826_v25  ;;  %1708 = vmatpush.msrb.mxu3 %v2918_v11  ;;  %v2904_v25 = vld [vmem:[%s3556_s14 + $0x608] sm:$0xff] }
 0x215   : > { %2743 = vmatmul.msk.f32.gmra.mxu2 %vm429_vm1, %v3709_v51  ;;  %2760 = vmatmul.msk.f32.gmra.mxu3 %vm429_vm1, %v3709_v51  ;;  %v2831_v51 = vld [vmem:[%s3556_s14 + $0x5d0] sm:$0xff] }
 0x216   : > { %1432 = vmatpush.msra.mxu0 %v2831_v51  ;;  %1456 = vmatpush.msra.mxu1 %v2824_v27 }
 0x217   : > { %1709 = vmatpush.msrb.mxu3 %v2916_v12 }
 0x218   : > { %2650 = vmatmul.msk.f32.gmra.mxu0 %vm429_vm1, %v3780_v3  ;;  %2667 = vmatmul.msk.f32.gmra.mxu1 %vm429_vm1, %v3780_v3 }
 0x219   : > { %1433 = vmatpush.msra.mxu0 %v2829_v20  ;;  %1457 = vmatpush.msra.mxu1 %v2822_v29  ;;  %v2907_v20 = vld [vmem:[%s3556_s14 + $0x620] sm:$0xff] }
 0x21a   : > { %1710 = vmatpush.msrb.mxu3 %v2914_v16 }
 0x21b   : > { %1434 = vmatpush.msra.mxu0 %v2827_v22  ;;  %1458 = vmatpush.msra.mxu1 %v2820_v30  ;;  %v2905_v22 = vld [vmem:[%s3556_s14 + $0x610] sm:$0xff] }
 0x21c   : > { %1711 = vmatpush.msrb.mxu3 %v2912_v50 }
 0x21d   : > { %2744 = vmatmul.msk.f32.gmra.mxu2 %vm429_vm1, %v3726_v63  ;;  %2761 = vmatmul.msk.f32.gmra.mxu3 %vm429_vm1, %v3726_v63  ;;  %v2825_v63 = vld [vmem:[%s3556_s14 + $0x5a0] sm:$0xff] }
 0x21e   : > { %1435 = vmatpush.msra.mxu0 %v2825_v63  ;;  %1459 = vmatpush.msra.mxu1 %v2818_v33  ;;  %v2903_v63 = vld [vmem:[%s3556_s14 + $0x600] sm:$0xff] }
 0x21f   : > { %1712 = vmatpush.msrb.mxu3 %v2910_v18 }
 0x220   : > { %2651 = vmatmul.msk.f32.gmra.mxu0 %vm429_vm1, %v3799_v10  ;;  %2668 = vmatmul.msk.f32.gmra.mxu1 %vm429_vm1, %v3799_v10 }
 0x221   : > { %1436 = vmatpush.msra.mxu0 %v2823_v26  ;;  %1460 = vmatpush.msra.mxu1 %v2816_v35 }
 0x222   : > { %1713 = vmatpush.msrb.mxu3 %v2908_v21 }
 0x223   : > { %1437 = vmatpush.msra.mxu0 %v2821_v28  ;;  %1461 = vmatpush.msra.mxu1 %v2814_v36 }
 0x224   : > { %1714 = vmatpush.msrb.mxu3 %v2906_v23 }
 0x225   : > { %2745 = vmatmul.msk.f32.gmra.mxu2 %vm429_vm1, %v3741_v0  ;;  %2762 = vmatmul.msk.f32.gmra.mxu3 %vm429_vm1, %v3741_v0  ;;  %v2819_v0 = vld [vmem:[%s3556_s14 + $0x570] sm:$0xff] }
 0x226   : > { %1438 = vmatpush.msra.mxu0 %v2819_v0  ;;  %1462 = vmatpush.msra.mxu1 %v2812_v38 }
 0x227   : > { %1715 = vmatpush.msrb.mxu3 %v2904_v25 }
 0x228   : > { %2652 = vmatmul.msk.f32.gmra.mxu0 %vm429_vm1, %v3818_v17  ;;  %2669 = vmatmul.msk.f32.gmra.mxu1 %vm429_vm1, %v3818_v17 }
 0x229   : > { %1439 = vmatpush.msra.mxu0 %v2817_v32  ;;  %1463 = vmatpush.msra.mxu1 %v2810_v40 }
 0x22b   : > { %1440 = vmatpush.msra.mxu0 %v2815_v34  ;;  %1464 = vmatpush.msra.mxu1 %v2808_v41 }
 0x22d   : > { %2746 = vmatmul.msk.f32.gmra.mxu2 %vm429_vm1, %v3754_v1  ;;  %2763 = vmatmul.msk.f32.gmra.mxu3 %vm429_vm1, %v3754_v1  ;;  %v2813_v1 = vld [vmem:[%s3556_s14 + $0x540] sm:$0xff] }
 0x22e   : > { %1441 = vmatpush.msra.mxu0 %v2813_v1  ;;  %1465 = vmatpush.msra.mxu1 %v2806_v44 }
 0x230   : > { %2653 = vmatmul.msk.f32.gmra.mxu0 %vm429_vm1, %v3837_v24  ;;  %2670 = vmatmul.msk.f32.gmra.mxu1 %vm429_vm1, %v3837_v24 }
 0x231   : > { %1442 = vmatpush.msra.mxu0 %v2811_v37 }
 0x233   : > { %1443 = vmatpush.msra.mxu0 %v2809_v39 }
 0x235   : > { %2747 = vmatmul.msk.f32.gmra.mxu2 %vm429_vm1, %v3767_v2  ;;  %2764 = vmatmul.msk.f32.gmra.mxu3 %vm429_vm1, %v3767_v2  ;;  %v2807_v2 = vld [vmem:[%s3556_s14 + $0x510] sm:$0xff] }
 0x236   : > { %1444 = vmatpush.msra.mxu0 %v2807_v2 }
 0x238   : > { %2654 = vmatmul.msk.f32.gmra.mxu0 %vm429_vm1, %v3856_v31  ;;  %2671 = vmatmul.msk.f32.gmra.mxu1 %vm429_vm1, %v3856_v31 }
 0x239   : > { %1445 = vmatpush.msra.mxu0 %v2805_v42 }
 0x23d   : > { %2748 = vmatmul.msk.f32.gmra.mxu2 %vm429_vm1, %v3780_v3  ;;  %2765 = vmatmul.msk.f32.gmra.mxu3 %vm429_vm1, %v3780_v3  ;;  %v2929_v3 = vld [vmem:[%s3556_s14 + $0x6d0] sm:$0xff] }
 0x23e   : > { %1682 = vmatpush.msrb.mxu2 %v2929_v3 }
 0x240   : > { %2655 = vmatmul.msk.f32.gmra.mxu0 %vm429_vm1, %v3881_v45  ;;  %2672 = vmatmul.msk.f32.gmra.mxu1 %vm429_vm1, %v3881_v45 }
 0x241   : > { %1683 = vmatpush.msrb.mxu2 %v2927_v56 }
 0x243   : > { %1684 = vmatpush.msrb.mxu2 %v2925_v53 }
 0x245   : > { %2749 = vmatmul.msk.f32.gmra.mxu2 %vm429_vm1, %v3799_v10  ;;  %2766 = vmatmul.msk.f32.gmra.mxu3 %vm429_vm1, %v3799_v10  ;;  %v2921_v10 = vld [vmem:[%s3556_s14 + $0x690] sm:$0xff] }
 0x246   : > { %1685 = vmatpush.msrb.mxu2 %v2923_v58 }
 0x248   : > { %2656 = vmatmul.msk.f32.gmra.mxu0 %vm429_vm1, %v3902_v61  ;;  %2673 = vmatmul.msk.f32.gmra.mxu1 %vm429_vm1, %v3902_v61 }
 0x249   : > { %1686 = vmatpush.msrb.mxu2 %v2921_v10 }
 0x24b   : > { %1687 = vmatpush.msrb.mxu2 %v2919_v4 }
 0x24d   : > { %2750 = vmatmul.msk.f32.gmra.mxu2 %vm429_vm1, %v3818_v17  ;;  %2767 = vmatmul.msk.f32.gmra.mxu3 %vm429_vm1, %v3818_v17  ;;  %v2915_v17 = vld [vmem:[%s3556_s14 + $0x660] sm:$0xff] }
 0x24e   : > { %1688 = vmatpush.msrb.mxu2 %v2917_v8 }
 0x250   : > { %2657 = vmatmul.msk.f32.gmra.mxu0 %vm429_vm1, %v3921_v9  ;;  %2674 = vmatmul.msk.f32.gmra.mxu1 %vm429_vm1, %v3921_v9 }
 0x251   : > { %1689 = vmatpush.msrb.mxu2 %v2915_v17 }
 0x253   : > { %1690 = vmatpush.msrb.mxu2 %v2913_v15 }
 0x255   : > { %v1001_v13 = vpop.f32.mrf.mxu0  ;;  %v1066_v14 = vpop.f32.mrf.mxu1  ;;  %2751 = vmatmul.msk.f32.gmra.mxu2 %vm429_vm1, %v3837_v24  ;;  %2768 = vmatmul.msk.f32.gmra.mxu3 %vm429_vm1, %v3837_v24  ;;  %v2909_v24 = vld [vmem:[%s3556_s14 + $0x630] sm:$0xff] }
 0x256   : > { %2675 = vst [vmem:[%s3939_s6 + $0x200] sm:$0xff] %v1001_v13  ;;  %1691 = vmatpush.msrb.mxu2 %v2911_v49 }
 0x257   : > { %2676 = vst [vmem:[%s3939_s6 + $0x208] sm:$0xff] %v1066_v14 }
 0x258   : > { %1446 = vmatmul.f32.vlgmr.msra.gmra.mxu0 %v4217_v48  ;;  %1466 = vmatmul.f32.vlgmr.msra.gmra.mxu1 %v4217_v48 }
 0x259   : > { %1692 = vmatpush.msrb.mxu2 %v2909_v24  ;;  %v1470_v24 = vmul.f32 0.6666667, %v4055_v6  ;;  %v4312_v6 = vld [vmem:[%s4879_s3] sm:$0xff] }
 0x25b   : > { %1693 = vmatpush.msrb.mxu2 %v2907_v20 }
 0x25d   : > { %v1004_v51 = vpop.f32.mrf.mxu0  ;;  %v1069_v19 = vpop.f32.mrf.mxu1  ;;  %2752 = vmatmul.msk.f32.gmra.mxu2 %vm429_vm1, %v3856_v31  ;;  %2769 = vmatmul.msk.f32.gmra.mxu3 %vm429_vm1, %v3856_v31 }
 0x25e   : > { %2677 = vst [vmem:[%s3939_s6 + $0x210] sm:$0xff] %v1004_v51  ;;  %1694 = vmatpush.msrb.mxu2 %v2905_v22 }
 0x25f   : > { %2678 = vst [vmem:[%s3939_s6 + $0x218] sm:$0xff] %v1069_v19  ;;  %v1471_v19 = vmul.f32 0.6666667, %v4057_v7 }
 0x260   : > { %1695 = vmatpush.msrb.mxu2 %v2903_v63 }
 0x265   : > { %v1007_v31 = vpop.f32.mrf.mxu0  ;;  %v1072_v26 = vpop.f32.mrf.mxu1  ;;  %2753 = vmatmul.msk.f32.gmra.mxu2 %vm429_vm1, %v3881_v45  ;;  %2770 = vmatmul.msk.f32.gmra.mxu3 %vm429_vm1, %v3881_v45 }
 0x266   : > { %2679 = vst [vmem:[%s3939_s6 + $0x220] sm:$0xff] %v1007_v31 }
 0x267   : > { %2680 = vst [vmem:[%s3939_s6 + $0x228] sm:$0xff] %v1072_v26 }
 0x26d   : > { %v1010_v27 = vpop.f32.mrf.mxu0  ;;  %v1075_v28 = vpop.f32.mrf.mxu1  ;;  %2754 = vmatmul.msk.f32.gmra.mxu2 %vm429_vm1, %v3902_v61  ;;  %2771 = vmatmul.msk.f32.gmra.mxu3 %vm429_vm1, %v3902_v61 }
 0x26e   : > { %2681 = vst [vmem:[%s3939_s6 + $0x230] sm:$0xff] %v1010_v27 }
 0x26f   : > { %2682 = vst [vmem:[%s3939_s6 + $0x238] sm:$0xff] %v1075_v28  ;;  %v4323_v28 = vld [vmem:[%s4879_s3 + $0x8] sm:$0xff] }
 0x275   : > { %v1013_v29 = vpop.f32.mrf.mxu0  ;;  %v1078_v0 = vpop.f32.mrf.mxu1  ;;  %2755 = vmatmul.msk.f32.gmra.mxu2 %vm429_vm1, %v3921_v9  ;;  %2772 = vmatmul.msk.f32.gmra.mxu3 %vm429_vm1, %v3921_v9 }
 0x276   : > { %2683 = vst [vmem:[%s3939_s6 + $0x240] sm:$0xff] %v1013_v29 }
 0x277   : > { %2684 = vst [vmem:[%s3939_s6 + $0x248] sm:$0xff] %v1078_v0 }
 0x27d   : > { %v1016_v45 = vpop.f32.mrf.mxu0  ;;  %v1081_v30 = vpop.f32.mrf.mxu1  ;;  %1696 = vmatmul.f32.vlgmr.msrb.gmra.mxu2 %v4217_v48  ;;  %1716 = vmatmul.f32.vlgmr.msrb.gmra.mxu3 %v4217_v48 }
 0x27e   : > { %2685 = vst [vmem:[%s3939_s6 + $0x250] sm:$0xff] %v1016_v45  ;;  %v4334_v45 = vld [vmem:[%s4879_s3 + $0x10] sm:$0xff] }
 0x27f   : > { %2686 = vst [vmem:[%s3939_s6 + $0x258] sm:$0xff] %v1081_v30 }
 0x280   : > { %v1251_v61 = vpop.f32.mrf.mxu2  ;;  %v1316_v32 = vpop.f32.mrf.mxu3 }
 0x281   : > { %2773 = vst [vmem:[%s3939_s6 + $0x300] sm:$0xff] %v1251_v61 }
 0x282   : > { %2774 = vst [vmem:[%s3939_s6 + $0x308] sm:$0xff] %v1316_v32  ;;  %v4345_v32 = vld [vmem:[%s4879_s3 + $0x18] sm:$0xff] }
 0x285   : > { %v1019_v9 = vpop.f32.mrf.mxu0  ;;  %v1084_v33 = vpop.f32.mrf.mxu1 }
 0x286   : > { %2687 = vst [vmem:[%s3939_s6 + $0x260] sm:$0xff] %v1019_v9 }
 0x287   : > { %2688 = vst [vmem:[%s3939_s6 + $0x268] sm:$0xff] %v1084_v33 }
 0x288   : > { %v1254_v34 = vpop.f32.mrf.mxu2  ;;  %v1319_v35 = vpop.f32.mrf.mxu3 }
 0x289   : > { %2775 = vst [vmem:[%s3939_s6 + $0x310] sm:$0xff] %v1254_v34  ;;  %v4356_v34 = vld [vmem:[%s4879_s3 + $0x20] sm:$0xff] }
 0x28a   : > { %2776 = vst [vmem:[%s3939_s6 + $0x318] sm:$0xff] %v1319_v35 }
 0x28d   : > { %v1022_v1 = vpop.f32.mrf.mxu0  ;;  %v1087_v36 = vpop.f32.mrf.mxu1 }
 0x28e   : > { %2689 = vst [vmem:[%s3939_s6 + $0x270] sm:$0xff] %v1022_v1 }
 0x28f   : > { %2690 = vst [vmem:[%s3939_s6 + $0x278] sm:$0xff] %v1087_v36 }
 0x290   : > { %v1257_v37 = vpop.f32.mrf.mxu2  ;;  %v1322_v38 = vpop.f32.mrf.mxu3 }
 0x291   : > { %2777 = vst [vmem:[%s3939_s6 + $0x320] sm:$0xff] %v1257_v37 }
 0x292   : > { %2778 = vst [vmem:[%s3939_s6 + $0x328] sm:$0xff] %v1322_v38 }
 0x295   : > { %v1025_v39 = vpop.f32.mrf.mxu0  ;;  %v1090_v40 = vpop.f32.mrf.mxu1 }
 0x296   : > { %2691 = vst [vmem:[%s3939_s6 + $0x280] sm:$0xff] %v1025_v39 }
 0x297   : > { %2692 = vst [vmem:[%s3939_s6 + $0x288] sm:$0xff] %v1090_v40 }
 0x298   : > { %v1260_v2 = vpop.f32.mrf.mxu2  ;;  %v1325_v41 = vpop.f32.mrf.mxu3 }
 0x299   : > { %2779 = vst [vmem:[%s3939_s6 + $0x330] sm:$0xff] %v1260_v2 }
 0x29a   : > { %2780 = vst [vmem:[%s3939_s6 + $0x338] sm:$0xff] %v1325_v41 }
 0x29d   : > { %v1028_v42 = vpop.f32.mrf.mxu0  ;;  %v1093_v44 = vpop.f32.mrf.mxu1 }
 0x29e   : > { %2693 = vst [vmem:[%s3939_s6 + $0x290] sm:$0xff] %v1028_v42 }
 0x29f   : > { %2694 = vst [vmem:[%s3939_s6 + $0x298] sm:$0xff] %v1093_v44  ;;  %v4373_v44 = vld [vmem:[%s4879_s3 + $0x28] sm:$0xff] }
 0x2a0   : > { %v1263_v60 = vpop.f32.mrf.mxu2  ;;  %v1328_v46 = vpop.f32.mrf.mxu3 }
 0x2a1   : > { %2781 = vst [vmem:[%s3939_s6 + $0x340] sm:$0xff] %v1263_v60  ;;  %v4388_v60 = vld [vmem:[%s4879_s3 + $0x30] sm:$0xff] }
 0x2a2   : > { %2782 = vst [vmem:[%s3939_s6 + $0x348] sm:$0xff] %v1328_v46  ;;  %v4401_v46 = vld [vmem:[%s4879_s3 + $0x38] sm:$0xff] }
 0x2a5   : > { %v1031_v47 = vpop.f32.mrf.mxu0  ;;  %v1096_v52 = vpop.f32.mrf.mxu1 }
 0x2a6   : > { %2695 = vst [vmem:[%s3939_s6 + $0x2a0] sm:$0xff] %v1031_v47  ;;  %v4414_v47 = vld [vmem:[%s4879_s3 + $0x40] sm:$0xff] }
 0x2a7   : > { %2696 = vst [vmem:[%s3939_s6 + $0x2a8] sm:$0xff] %v1096_v52  ;;  %v3031_v52 = vld [vmem:[%s3556_s14 + $0x7f0] sm:$0xff] }
 0x2a8   : > { %v1266_v3 = vpop.f32.mrf.mxu2  ;;  %v1331_v55 = vpop.f32.mrf.mxu3 }
 0x2a9   : > { %2783 = vst [vmem:[%s3939_s6 + $0x350] sm:$0xff] %v1266_v3  ;;  %v3032_v3 = vld [vmem:[%s3556_s14 + $0x7f8] sm:$0xff] }
 0x2aa   : > { %2784 = vst [vmem:[%s3939_s6 + $0x358] sm:$0xff] %v1331_v55  ;;  %v3029_v55 = vld [vmem:[%s3556_s14 + $0x7e0] sm:$0xff] }
 0x2ad   : > { %v1034_v56 = vpop.f32.mrf.mxu0  ;;  %v1099_v57 = vpop.f32.mrf.mxu1 }
 0x2ae   : > { %2697 = vst [vmem:[%s3939_s6 + $0x2b0] sm:$0xff] %v1034_v56  ;;  %v3030_v56 = vld [vmem:[%s3556_s14 + $0x7e8] sm:$0xff] }
 0x2af   : > { %2698 = vst [vmem:[%s3939_s6 + $0x2b8] sm:$0xff] %v1099_v57  ;;  %v3027_v57 = vld [vmem:[%s3556_s14 + $0x7d0] sm:$0xff] }
 0x2b0   : > { %v1269_v53 = vpop.f32.mrf.mxu2  ;;  %v1334_v54 = vpop.f32.mrf.mxu3 }
 0x2b1   : > { %2785 = vst [vmem:[%s3939_s6 + $0x360] sm:$0xff] %v1269_v53  ;;  %v3028_v53 = vld [vmem:[%s3556_s14 + $0x7d8] sm:$0xff] }
 0x2b2   : > { %2786 = vst [vmem:[%s3939_s6 + $0x368] sm:$0xff] %v1334_v54  ;;  %v3025_v54 = vld [vmem:[%s3556_s14 + $0x7c0] sm:$0xff] }
 0x2b5   : > { %v1037_v58 = vpop.f32.mrf.mxu0  ;;  %v1102_v59 = vpop.f32.mrf.mxu1 }
 0x2b6   : > { %2699 = vst [vmem:[%s3939_s6 + $0x2c0] sm:$0xff] %v1037_v58  ;;  %v3026_v58 = vld [vmem:[%s3556_s14 + $0x7c8] sm:$0xff] }
 0x2b7   : > { %2700 = vst [vmem:[%s3939_s6 + $0x2c8] sm:$0xff] %v1102_v59  ;;  %v4435_v59 = vld [vmem:[%s4879_s3 + $0x48] sm:$0xff] }
 0x2b8   : > { %v1272_v10 = vpop.f32.mrf.mxu2  ;;  %v1337_v62 = vpop.f32.mrf.mxu3 }
 0x2b9   : > { %2787 = vst [vmem:[%s3939_s6 + $0x370] sm:$0xff] %v1272_v10  ;;  %v3023_v10 = vld [vmem:[%s3556_s14 + $0x7b0] sm:$0xff] }
 0x2ba   : > { %2788 = vst [vmem:[%s3939_s6 + $0x378] sm:$0xff] %v1337_v62  ;;  %v3024_v62 = vld [vmem:[%s3556_s14 + $0x7b8] sm:$0xff] }
 0x2bd   : > { %v1040_v4 = vpop.f32.mrf.mxu0  ;;  %v1105_v5 = vpop.f32.mrf.mxu1 }
 0x2be   : > { %2701 = vst [vmem:[%s3939_s6 + $0x2d0] sm:$0xff] %v1040_v4  ;;  %v3021_v4 = vld [vmem:[%s3556_s14 + $0x7a0] sm:$0xff] }
 0x2bf   : > { %2702 = vst [vmem:[%s3939_s6 + $0x2d8] sm:$0xff] %v1105_v5  ;;  %v3022_v5 = vld [vmem:[%s3556_s14 + $0x7a8] sm:$0xff] }
 0x2c0   : > { %v1275_v8 = vpop.f32.mrf.mxu2  ;;  %v1340_v11 = vpop.f32.mrf.mxu3 }
 0x2c1   : > { %2789 = vst [vmem:[%s3939_s6 + $0x380] sm:$0xff] %v1275_v8  ;;  %v3019_v8 = vld [vmem:[%s3556_s14 + $0x790] sm:$0xff] }
 0x2c2   : > { %2790 = vst [vmem:[%s3939_s6 + $0x388] sm:$0xff] %v1340_v11  ;;  %v3020_v11 = vld [vmem:[%s3556_s14 + $0x798] sm:$0xff] }
 0x2c5   : > { %v1043_v17 = vpop.f32.mrf.mxu0  ;;  %v1108_v12 = vpop.f32.mrf.mxu1 }
 0x2c6   : > { %2703 = vst [vmem:[%s3939_s6 + $0x2e0] sm:$0xff] %v1043_v17  ;;  %v3017_v17 = vld [vmem:[%s3556_s14 + $0x780] sm:$0xff] }
 0x2c7   : > { %2704 = vst [vmem:[%s3939_s6 + $0x2e8] sm:$0xff] %v1108_v12  ;;  %v3018_v12 = vld [vmem:[%s3556_s14 + $0x788] sm:$0xff] }
 0x2c8   : > { %v1278_v13 = vpop.f32.mrf.mxu2  ;;  %v1343_v14 = vpop.f32.mrf.mxu3 }
 0x2c9   : > { %2791 = vst [vmem:[%s3939_s6 + $0x390] sm:$0xff] %v1278_v13  ;;  %v4456_v13 = vld [vmem:[%s4879_s3 + $0x50] sm:$0xff] }
 0x2ca   : > { %2792 = vst [vmem:[%s3939_s6 + $0x398] sm:$0xff] %v1343_v14  ;;  %v3015_v14 = vld [vmem:[%s3556_s14 + $0x770] sm:$0xff] }
 0x2cd   : > { %v1046_v15 = vpop.f32.mrf.mxu0  ;;  %v1111_v16 = vpop.f32.mrf.mxu1 }
 0x2ce   : > { %2705 = vst [vmem:[%s3939_s6 + $0x2f0] sm:$0xff] %v1046_v15  ;;  %v3016_v15 = vld [vmem:[%s3556_s14 + $0x778] sm:$0xff] }
 0x2cf   : > { %2706 = vst [vmem:[%s3939_s6 + $0x2f8] sm:$0xff] %v1111_v16  ;;  %v3013_v16 = vld [vmem:[%s3556_s14 + $0x760] sm:$0xff] }
 0x2d0   : > { %v1281_v49 = vpop.f32.mrf.mxu2  ;;  %v1346_v50 = vpop.f32.mrf.mxu3 }
 0x2d1   : > { %2793 = vst [vmem:[%s3939_s6 + $0x3a0] sm:$0xff] %v1281_v49  ;;  %v3014_v49 = vld [vmem:[%s3556_s14 + $0x768] sm:$0xff] }
 0x2d2   : > { %2794 = vst [vmem:[%s3939_s6 + $0x3a8] sm:$0xff] %v1346_v50  ;;  %v3011_v50 = vld [vmem:[%s3556_s14 + $0x750] sm:$0xff] }
 0x2d5   : > { %v1447_v18 = vpop.f32.mrf.mxu0  ;;  %v1467_v51 = vpop.f32.mrf.mxu1 }
 0x2d6   : > { %v1472_v20 = vmul.f32 0.33333334, %v1447_v18  ;;  %v1473_v21 = vmul.f32 0.33333334, %v1467_v51  ;;  %v1720_v35 = vmul.f32 0.6666667, %v1447_v18 }
 0x2d7   : > { %v1721_v37 = vmul.f32 0.6666667, %v1467_v51  ;;  %v3009_v18 = vld [vmem:[%s3556_s14 + $0x740] sm:$0xff]  ;;  %v3010_v51 = vld [vmem:[%s3556_s14 + $0x748] sm:$0xff] }
 0x2d8   : > { %v1474_v22 = vadd.f32 %v1472_v20, %v1470_v24  ;;  %v1475_v23 = vadd.f32 %v1473_v21, %v1471_v19  ;;  %v1284_v63 = vpop.f32.mrf.mxu2  ;;  %v1349_v25 = vpop.f32.mrf.mxu3  ;;  %v3012_v24 = vld [vmem:[%s3556_s14 + $0x758] sm:$0xff]  ;;  %v3007_v20 = vld [vmem:[%s3556_s14 + $0x730] sm:$0xff] }
 0x2d9   : > { %2795 = vst [vmem:[%s3939_s6 + $0x3b0] sm:$0xff] %v1284_v63  ;;  %v4477_v19 = vld [vmem:[%s4879_s3 + $0x58] sm:$0xff]  ;;  %v3003_v63 = vld [vmem:[%s3556_s14 + $0x710] sm:$0xff] }
 0x2da   : > { %v1476_v31 = vadd.f32 %v1474_v22, %v3673_v43  ;;  %v1477_v26 = vadd.f32 %v1475_v23, %v3673_v43  ;;  %2796 = vst [vmem:[%s3939_s6 + $0x3b8] sm:$0xff] %v1349_v25  ;;  %v3008_v21 = vld [vmem:[%s3556_s14 + $0x738] sm:$0xff]  ;;  %v3005_v22 = vld [vmem:[%s3556_s14 + $0x720] sm:$0xff]  ;;  %v3006_v23 = vld [vmem:[%s3556_s14 + $0x728] sm:$0xff] }
 0x2db   : > { %v3004_v25 = vld [vmem:[%s3556_s14 + $0x718] sm:$0xff] }
 0x2dc   : > { %2837 = vmatpush.msk.msrb.mxu0 %vm478_vm0, %v1476_v31  ;;  %2854 = vmatpush.msk.msrb.mxu1 %vm478_vm0, %v1477_v26  ;;  %v3001_v31 = vld [vmem:[%s3556_s14 + $0x700] sm:$0xff]  ;;  %v3002_v26 = vld [vmem:[%s3556_s14 + $0x708] sm:$0xff]  ;;  %s3350_s14 = scalar_lea.hbm %s4880_s4, 4096 }
 0x2dd   : > { %2838 = vmatmul.msk.f32.vlgmr.msrb.gmra.mxu0 %vm429_vm1, %v4312_v6  ;;  %2855 = vmatmul.msk.f32.vlgmr.msrb.gmra.mxu1 %vm429_vm1, %v4312_v6  ;;  %p3352_p12 = scmp.lt.s32.totalorder %s3350_s14, %s3346_s18 }
 0x2de   : > { %1930 = vmatpush.msra.mxu0 %v3031_v52  ;;  %1950 = vmatpush.msra.mxu1 %v3032_v3 }
 0x2df   : > { %p3353_p0 = por %p3352_p12, %p3351_p11 }
 0x2e0   : > { %v1287_v7 = vpop.f32.mrf.mxu2  ;;  %v1352_v27 = vpop.f32.mrf.mxu3  ;;  %1931 = vmatpush.msra.mxu0 %v3029_v55  ;;  %1951 = vmatpush.msra.mxu1 %v3030_v56 }
 0x2e1   : > { %2797 = vst [vmem:[%s3939_s6 + $0x3c0] sm:$0xff] %v1287_v7  ;;  %v4498_v7 = vld [vmem:[%s4879_s3 + $0x60] sm:$0xff]  ;;  %p3354_p1 = pnand %p3353_p0, %p3349_p7 }
 0x2e2   : > { %2798 = vst [vmem:[%s3939_s6 + $0x3c8] sm:$0xff] %v1352_v27  ;;  %1932 = vmatpush.msra.mxu0 %v3027_v57  ;;  %1952 = vmatpush.msra.mxu1 %v3028_v53  ;;  %v4511_v27 = vld [vmem:[%s4879_s3 + $0x68] sm:$0xff] }
 0x2e4   : > { %1933 = vmatpush.msra.mxu0 %v3025_v54  ;;  %1953 = vmatpush.msra.mxu1 %v3026_v58 }
 0x2e5   : > { %2839 = vmatmul.msk.f32.gmra.mxu0 %vm429_vm1, %v4323_v28  ;;  %2856 = vmatmul.msk.f32.gmra.mxu1 %vm429_vm1, %v4323_v28 }
 0x2e6   : > { %1934 = vmatpush.msra.mxu0 %v3023_v10  ;;  %1954 = vmatpush.msra.mxu1 %v3024_v62 }
 0x2e8   : > { %v1290_v29 = vpop.f32.mrf.mxu2  ;;  %v1355_v0 = vpop.f32.mrf.mxu3  ;;  %1935 = vmatpush.msra.mxu0 %v3021_v4  ;;  %1955 = vmatpush.msra.mxu1 %v3022_v5 }
 0x2e9   : > { %2799 = vst [vmem:[%s3939_s6 + $0x3d0] sm:$0xff] %v1290_v29  ;;  %v4524_v29 = vld [vmem:[%s4879_s3 + $0x70] sm:$0xff] }
 0x2ea   : > { %2800 = vst [vmem:[%s3939_s6 + $0x3d8] sm:$0xff] %v1355_v0  ;;  %1936 = vmatpush.msra.mxu0 %v3019_v8  ;;  %1956 = vmatpush.msra.mxu1 %v3020_v11  ;;  %v4537_v0 = vld [vmem:[%s4879_s3 + $0x78] sm:$0xff] }
 0x2ec   : > { %1937 = vmatpush.msra.mxu0 %v3017_v17  ;;  %1957 = vmatpush.msra.mxu1 %v3018_v12 }
 0x2ed   : > { %2840 = vmatmul.msk.f32.gmra.mxu0 %vm429_vm1, %v4334_v45  ;;  %2857 = vmatmul.msk.f32.gmra.mxu1 %vm429_vm1, %v4334_v45 }
 0x2ee   : > { %1938 = vmatpush.msra.mxu0 %v3015_v14  ;;  %1958 = vmatpush.msra.mxu1 %v3016_v15 }
 0x2f0   : > { %v1293_v30 = vpop.f32.mrf.mxu2  ;;  %v1358_v61 = vpop.f32.mrf.mxu3  ;;  %1939 = vmatpush.msra.mxu0 %v3013_v16  ;;  %1959 = vmatpush.msra.mxu1 %v3014_v49 }
 0x2f1   : > { %2801 = vst [vmem:[%s3939_s6 + $0x3e0] sm:$0xff] %v1293_v30 }
 0x2f2   : > { %2802 = vst [vmem:[%s3939_s6 + $0x3e8] sm:$0xff] %v1358_v61  ;;  %1940 = vmatpush.msra.mxu0 %v3011_v50  ;;  %1960 = vmatpush.msra.mxu1 %v3012_v24 }
 0x2f4   : > { %1941 = vmatpush.msra.mxu0 %v3009_v18  ;;  %1961 = vmatpush.msra.mxu1 %v3010_v51 }
 0x2f5   : > { %2841 = vmatmul.msk.f32.gmra.mxu0 %vm429_vm1, %v4345_v32  ;;  %2858 = vmatmul.msk.f32.gmra.mxu1 %vm429_vm1, %v4345_v32 }
 0x2f6   : > { %1942 = vmatpush.msra.mxu0 %v3007_v20  ;;  %1962 = vmatpush.msra.mxu1 %v3008_v21 }
 0x2f8   : > { %v1296_v9 = vpop.f32.mrf.mxu2  ;;  %v1361_v33 = vpop.f32.mrf.mxu3  ;;  %1943 = vmatpush.msra.mxu0 %v3005_v22  ;;  %1963 = vmatpush.msra.mxu1 %v3006_v23 }
 0x2f9   : > { %2803 = vst [vmem:[%s3939_s6 + $0x3f0] sm:$0xff] %v1296_v9 }
 0x2fa   : > { %2804 = vst [vmem:[%s3939_s6 + $0x3f8] sm:$0xff] %v1361_v33  ;;  %1944 = vmatpush.msra.mxu0 %v3003_v63  ;;  %1964 = vmatpush.msra.mxu1 %v3004_v25 }
 0x2fc   : > { %1945 = vmatpush.msra.mxu0 %v3001_v31  ;;  %1965 = vmatpush.msra.mxu1 %v3002_v26 }
 0x2fd   : > { %2842 = vmatmul.msk.f32.gmra.mxu0 %vm429_vm1, %v4356_v34  ;;  %2859 = vmatmul.msk.f32.gmra.mxu1 %vm429_vm1, %v4356_v34 }
 0x300   : > { %v4362_v1 = vpop.f32.mrf.mxu2  ;;  %v4364_v36 = vpop.f32.mrf.mxu3 }
 0x301   : > { %v1722_v38 = vmul.f32 0.33333334, %v4362_v1  ;;  %v1723_v39 = vmul.f32 0.33333334, %v4364_v36  ;;  %v1970_v51 = vmul.f32 0.6666667, %v4362_v1 }
 0x302   : > { %v1971_v20 = vmul.f32 0.6666667, %v4364_v36 }
 0x303   : > { %v1724_v40 = vadd.f32 %v1722_v38, %v1720_v35  ;;  %v1725_v2 = vadd.f32 %v1723_v39, %v1721_v37 }
 0x305   : > { %v1726_v41 = vadd.f32 %v1724_v40, %v3673_v43  ;;  %v1727_v42 = vadd.f32 %v1725_v2, %v3673_v43  ;;  %2843 = vmatmul.msk.f32.gmra.mxu0 %vm429_vm1, %v4373_v44  ;;  %2860 = vmatmul.msk.f32.gmra.mxu1 %vm429_vm1, %v4373_v44 }
 0x307   : > { %2935 = vmatpush.msk.msra.mxu2 %vm478_vm0, %v1726_v41  ;;  %2952 = vmatpush.msk.msra.mxu3 %vm478_vm0, %v1727_v42 }
 0x308   : > { %2936 = vmatmul.msk.f32.vlgmr.msra.gmra.mxu2 %vm429_vm1, %v4312_v6  ;;  %2953 = vmatmul.msk.f32.vlgmr.msra.gmra.mxu3 %vm429_vm1, %v4312_v6 }
 0x30d   : > { %2844 = vmatmul.msk.f32.gmra.mxu0 %vm429_vm1, %v4388_v60  ;;  %2861 = vmatmul.msk.f32.gmra.mxu1 %vm429_vm1, %v4388_v60 }
 0x310   : > { %2937 = vmatmul.msk.f32.gmra.mxu2 %vm429_vm1, %v4323_v28  ;;  %2954 = vmatmul.msk.f32.gmra.mxu3 %vm429_vm1, %v4323_v28 }
 0x315   : > { %2845 = vmatmul.msk.f32.gmra.mxu0 %vm429_vm1, %v4401_v46  ;;  %2862 = vmatmul.msk.f32.gmra.mxu1 %vm429_vm1, %v4401_v46 }
 0x318   : > { %2938 = vmatmul.msk.f32.gmra.mxu2 %vm429_vm1, %v4334_v45  ;;  %2955 = vmatmul.msk.f32.gmra.mxu3 %vm429_vm1, %v4334_v45 }
 0x31d   : > { %2846 = vmatmul.msk.f32.gmra.mxu0 %vm429_vm1, %v4414_v47  ;;  %2863 = vmatmul.msk.f32.gmra.mxu1 %vm429_vm1, %v4414_v47 }
 0x320   : > { %2939 = vmatmul.msk.f32.gmra.mxu2 %vm429_vm1, %v4345_v32  ;;  %2956 = vmatmul.msk.f32.gmra.mxu3 %vm429_vm1, %v4345_v32 }
 0x325   : > { %2847 = vmatmul.msk.f32.gmra.mxu0 %vm429_vm1, %v4435_v59  ;;  %2864 = vmatmul.msk.f32.gmra.mxu1 %vm429_vm1, %v4435_v59 }
 0x328   : > { %2940 = vmatmul.msk.f32.gmra.mxu2 %vm429_vm1, %v4356_v34  ;;  %2957 = vmatmul.msk.f32.gmra.mxu3 %vm429_vm1, %v4356_v34 }
 0x32d   : > { %2848 = vmatmul.msk.f32.gmra.mxu0 %vm429_vm1, %v4456_v13  ;;  %2865 = vmatmul.msk.f32.gmra.mxu1 %vm429_vm1, %v4456_v13 }
 0x330   : > { %2941 = vmatmul.msk.f32.gmra.mxu2 %vm429_vm1, %v4373_v44  ;;  %2958 = vmatmul.msk.f32.gmra.mxu3 %vm429_vm1, %v4373_v44 }
 0x335   : > { %2849 = vmatmul.msk.f32.gmra.mxu0 %vm429_vm1, %v4477_v19  ;;  %2866 = vmatmul.msk.f32.gmra.mxu1 %vm429_vm1, %v4477_v19 }
 0x338   : > { %2942 = vmatmul.msk.f32.gmra.mxu2 %vm429_vm1, %v4388_v60  ;;  %2959 = vmatmul.msk.f32.gmra.mxu3 %vm429_vm1, %v4388_v60 }
 0x33d   : > { %2850 = vmatmul.msk.f32.gmra.mxu0 %vm429_vm1, %v4498_v7  ;;  %2867 = vmatmul.msk.f32.gmra.mxu1 %vm429_vm1, %v4498_v7 }
 0x340   : > { %2943 = vmatmul.msk.f32.gmra.mxu2 %vm429_vm1, %v4401_v46  ;;  %2960 = vmatmul.msk.f32.gmra.mxu3 %vm429_vm1, %v4401_v46 }
 0x345   : > { %2851 = vmatmul.msk.f32.gmra.mxu0 %vm429_vm1, %v4511_v27  ;;  %2868 = vmatmul.msk.f32.gmra.mxu1 %vm429_vm1, %v4511_v27 }
 0x348   : > { %2944 = vmatmul.msk.f32.gmra.mxu2 %vm429_vm1, %v4414_v47  ;;  %2961 = vmatmul.msk.f32.gmra.mxu3 %vm429_vm1, %v4414_v47 }
 0x34d   : > { %2852 = vmatmul.msk.f32.gmra.mxu0 %vm429_vm1, %v4524_v29  ;;  %2869 = vmatmul.msk.f32.gmra.mxu1 %vm429_vm1, %v4524_v29 }
 0x350   : > { %2945 = vmatmul.msk.f32.gmra.mxu2 %vm429_vm1, %v4435_v59  ;;  %2962 = vmatmul.msk.f32.gmra.mxu3 %vm429_vm1, %v4435_v59 }
 0x355   : > { %2853 = vmatmul.msk.f32.gmra.mxu0 %vm429_vm1, %v4537_v0  ;;  %2870 = vmatmul.msk.f32.gmra.mxu1 %vm429_vm1, %v4537_v0 }
 0x358   : > { %2946 = vmatmul.msk.f32.gmra.mxu2 %vm429_vm1, %v4456_v13  ;;  %2963 = vmatmul.msk.f32.gmra.mxu3 %vm429_vm1, %v4456_v13 }
 0x35a   : > { %v1501_v30 = vpop.f32.mrf.mxu0  ;;  %v1566_v61 = vpop.f32.mrf.mxu1 }
 0x35b   : > { %2871 = vst [vmem:[%s3939_s6 + $0x400] sm:$0xff] %v1501_v30 }
 0x35c   : > { %2872 = vst [vmem:[%s3939_s6 + $0x408] sm:$0xff] %v1566_v61 }
 0x35d   : > { %1946 = vmatmul.f32.vlgmr.msra.gmra.mxu0 %v4217_v48  ;;  %1966 = vmatmul.f32.vlgmr.msra.gmra.mxu1 %v4217_v48 }
 0x360   : > { %2947 = vmatmul.msk.f32.gmra.mxu2 %vm429_vm1, %v4477_v19  ;;  %2964 = vmatmul.msk.f32.gmra.mxu3 %vm429_vm1, %v4477_v19 }
 0x362   : > { %v1504_v9 = vpop.f32.mrf.mxu0  ;;  %v1569_v33 = vpop.f32.mrf.mxu1 }
 0x363   : > { %2873 = vst [vmem:[%s3939_s6 + $0x410] sm:$0xff] %v1504_v9 }
 0x364   : > { %2874 = vst [vmem:[%s3939_s6 + $0x418] sm:$0xff] %v1569_v33 }
 0x368   : > { %2948 = vmatmul.msk.f32.gmra.mxu2 %vm429_vm1, %v4498_v7  ;;  %2965 = vmatmul.msk.f32.gmra.mxu3 %vm429_vm1, %v4498_v7 }
 0x36a   : > { %v1507_v48 = vpop.f32.mrf.mxu0  ;;  %v1572_v35 = vpop.f32.mrf.mxu1 }
 0x36b   : > { %2875 = vst [vmem:[%s3939_s6 + $0x420] sm:$0xff] %v1507_v48 }
 0x36c   : > { %2876 = vst [vmem:[%s3939_s6 + $0x428] sm:$0xff] %v1572_v35 }
 0x370   : > { %2949 = vmatmul.msk.f32.gmra.mxu2 %vm429_vm1, %v4511_v27  ;;  %2966 = vmatmul.msk.f32.gmra.mxu3 %vm429_vm1, %v4511_v27 }
 0x372   : > { %v1510_v37 = vpop.f32.mrf.mxu0  ;;  %v1575_v38 = vpop.f32.mrf.mxu1 }
 0x373   : > { %2877 = vst [vmem:[%s3939_s6 + $0x430] sm:$0xff] %v1510_v37 }
 0x374   : > { %2878 = vst [vmem:[%s3939_s6 + $0x438] sm:$0xff] %v1575_v38 }
 0x378   : > { %2950 = vmatmul.msk.f32.gmra.mxu2 %vm429_vm1, %v4524_v29  ;;  %2967 = vmatmul.msk.f32.gmra.mxu3 %vm429_vm1, %v4524_v29 }
 0x37a   : > { %v1513_v39 = vpop.f32.mrf.mxu0  ;;  %v1578_v40 = vpop.f32.mrf.mxu1 }
 0x37b   : > { %2879 = vst [vmem:[%s3939_s6 + $0x440] sm:$0xff] %v1513_v39 }
 0x37c   : > { %2880 = vst [vmem:[%s3939_s6 + $0x448] sm:$0xff] %v1578_v40 }
 0x380   : > { %2951 = vmatmul.msk.f32.gmra.mxu2 %vm429_vm1, %v4537_v0  ;;  %2968 = vmatmul.msk.f32.gmra.mxu3 %vm429_vm1, %v4537_v0 }
 0x382   : > { %v1516_v2 = vpop.f32.mrf.mxu0  ;;  %v1581_v41 = vpop.f32.mrf.mxu1 }
 0x383   : > { %2881 = vst [vmem:[%s3939_s6 + $0x450] sm:$0xff] %v1516_v2 }
 0x384   : > { %2882 = vst [vmem:[%s3939_s6 + $0x458] sm:$0xff] %v1581_v41 }
 0x38a   : > { %v1519_v42 = vpop.f32.mrf.mxu0  ;;  %v1584_v52 = vpop.f32.mrf.mxu1 }
 0x38b   : > { %2883 = vst [vmem:[%s3939_s6 + $0x460] sm:$0xff] %v1519_v42  ;;  %v1751_v15 = vpop.f32.mrf.mxu2  ;;  %v1816_v16 = vpop.f32.mrf.mxu3 }
 0x38c   : > { %2884 = vst [vmem:[%s3939_s6 + $0x468] sm:$0xff] %v1584_v52 }
 0x38d   : > { %2969 = vst [vmem:[%s3939_s6 + $0x500] sm:$0xff] %v1751_v15 }
 0x38e   : > { %2970 = vst [vmem:[%s3939_s6 + $0x508] sm:$0xff] %v1816_v16 }
 0x392   : > { %v1522_v3 = vpop.f32.mrf.mxu0  ;;  %v1587_v55 = vpop.f32.mrf.mxu1 }
 0x393   : > { %2885 = vst [vmem:[%s3939_s6 + $0x470] sm:$0xff] %v1522_v3  ;;  %v1754_v24 = vpop.f32.mrf.mxu2  ;;  %v1819_v18 = vpop.f32.mrf.mxu3 }
 0x394   : > { %2886 = vst [vmem:[%s3939_s6 + $0x478] sm:$0xff] %v1587_v55 }
 0x395   : > { %2971 = vst [vmem:[%s3939_s6 + $0x510] sm:$0xff] %v1754_v24 }
 0x396   : > { %2972 = vst [vmem:[%s3939_s6 + $0x518] sm:$0xff] %v1819_v18 }
 0x39a   : > { %v1525_v56 = vpop.f32.mrf.mxu0  ;;  %v1590_v57 = vpop.f32.mrf.mxu1 }
 0x39b   : > { %2887 = vst [vmem:[%s3939_s6 + $0x480] sm:$0xff] %v1525_v56  ;;  %v1757_v26 = vpop.f32.mrf.mxu2  ;;  %v1822_v30 = vpop.f32.mrf.mxu3 }
 0x39c   : > { %2888 = vst [vmem:[%s3939_s6 + $0x488] sm:$0xff] %v1590_v57 }
 0x39d   : > { %2973 = vst [vmem:[%s3939_s6 + $0x520] sm:$0xff] %v1757_v26 }
 0x39e   : > { %2974 = vst [vmem:[%s3939_s6 + $0x528] sm:$0xff] %v1822_v30 }
 0x3a2   : > { %v1528_v53 = vpop.f32.mrf.mxu0  ;;  %v1593_v54 = vpop.f32.mrf.mxu1 }
 0x3a3   : > { %2889 = vst [vmem:[%s3939_s6 + $0x490] sm:$0xff] %v1528_v53  ;;  %v1760_v33 = vpop.f32.mrf.mxu2  ;;  %v1825_v48 = vpop.f32.mrf.mxu3 }
 0x3a4   : > { %2890 = vst [vmem:[%s3939_s6 + $0x498] sm:$0xff] %v1593_v54 }
 0x3a5   : > { %2975 = vst [vmem:[%s3939_s6 + $0x530] sm:$0xff] %v1760_v33 }
 0x3a6   : > { %2976 = vst [vmem:[%s3939_s6 + $0x538] sm:$0xff] %v1825_v48 }
 0x3aa   : > { %v1531_v58 = vpop.f32.mrf.mxu0  ;;  %v1596_v10 = vpop.f32.mrf.mxu1 }
 0x3ab   : > { %2891 = vst [vmem:[%s3939_s6 + $0x4a0] sm:$0xff] %v1531_v58  ;;  %v1828_v35 = vpop.f32.mrf.mxu3 }
 0x3ac   : > { %2892 = vst [vmem:[%s3939_s6 + $0x4a8] sm:$0xff] %v1596_v10 }
 0x3ad   : > { %2978 = vst [vmem:[%s3939_s6 + $0x548] sm:$0xff] %v1828_v35 }
 0x3b2   : > { %v1534_v62 = vpop.f32.mrf.mxu0  ;;  %v1599_v4 = vpop.f32.mrf.mxu1 }
 0x3b3   : > { %2893 = vst [vmem:[%s3939_s6 + $0x4b0] sm:$0xff] %v1534_v62 }
 0x3b4   : > { %2894 = vst [vmem:[%s3939_s6 + $0x4b8] sm:$0xff] %v1599_v4 }
 0x3ba   : > { %v1537_v5 = vpop.f32.mrf.mxu0  ;;  %v1602_v8 = vpop.f32.mrf.mxu1 }
 0x3bb   : > { %2895 = vst [vmem:[%s3939_s6 + $0x4c0] sm:$0xff] %v1537_v5 }
 0x3bc   : > { %2896 = vst [vmem:[%s3939_s6 + $0x4c8] sm:$0xff] %v1602_v8 }
 0x3c2   : > { %v1540_v11 = vpop.f32.mrf.mxu0  ;;  %v1605_v17 = vpop.f32.mrf.mxu1 }
 0x3c3   : > { %2897 = vst [vmem:[%s3939_s6 + $0x4d0] sm:$0xff] %v1540_v11 }
 0x3c4   : > { %2898 = vst [vmem:[%s3939_s6 + $0x4d8] sm:$0xff] %v1605_v17 }
 0x3ca   : > { %v1543_v12 = vpop.f32.mrf.mxu0  ;;  %v1608_v14 = vpop.f32.mrf.mxu1 }
 0x3cb   : > { %2899 = vst [vmem:[%s3939_s6 + $0x4e0] sm:$0xff] %v1543_v12 }
 0x3cc   : > { %2900 = vst [vmem:[%s3939_s6 + $0x4e8] sm:$0xff] %v1608_v14 }
 0x3d2   : > { %v1546_v49 = vpop.f32.mrf.mxu0  ;;  %v1611_v50 = vpop.f32.mrf.mxu1 }
 0x3d3   : > { %2901 = vst [vmem:[%s3939_s6 + $0x4f0] sm:$0xff] %v1546_v49 }
 0x3d4   : > { %2902 = vst [vmem:[%s3939_s6 + $0x4f8] sm:$0xff] %v1611_v50 }
 0x3da   : > { %v1947_v21 = vpop.f32.mrf.mxu0  ;;  %v1967_v22 = vpop.f32.mrf.mxu1 }
 0x3db   : > { %v1972_v23 = vmul.f32 0.33333334, %v1947_v21  ;;  %v2147_v63 = vadd.f32 %v1947_v21, %v3673_v43  ;;  %v1973_v25 = vmul.f32 0.33333334, %v1967_v22  ;;  %v2148_v31 = vadd.f32 %v1967_v22, %v3673_v43 }
 0x3dd   : > { %v1974_v61 = vadd.f32 %v1972_v23, %v1970_v51  ;;  %v1975_v9 = vadd.f32 %v1973_v25, %v1971_v20  ;;  %3172 = vmatpush.msk.msrb.mxu2 %vm478_vm0, %v2147_v63  ;;  %3173 = vmatpush.msk.msrb.mxu3 %vm478_vm0, %v2148_v31 }
 0x3de   : > { %3101 = vmatmul.msk.f32.vlgmr.msrb.gmra.mxu2 %vm429_vm1, %v4323_v28  ;;  %3118 = vmatmul.msk.f32.vlgmr.msrb.gmra.mxu3 %vm429_vm1, %v4323_v28 }
 0x3df   : > { %v1976_v1 = vadd.f32 %v1974_v61, %v3673_v43  ;;  %v1977_v36 = vadd.f32 %v1975_v9, %v3673_v43  ;;  %v1763_v43 = vpop.f32.mrf.mxu2 }
 0x3e0   : > { %2977 = vst [vmem:[%s3939_s6 + $0x540] sm:$0xff] %v1763_v43 }
 0x3e1   : > { %3033 = vmatpush.msk.msrb.mxu0 %vm478_vm0, %v1976_v1  ;;  %3050 = vmatpush.msk.msrb.mxu1 %vm478_vm0, %v1977_v36 }
 0x3e2   : > { %3034 = vmatmul.msk.f32.vlgmr.msrb.gmra.mxu0 %vm429_vm1, %v4312_v6  ;;  %3051 = vmatmul.msk.f32.vlgmr.msrb.gmra.mxu1 %vm429_vm1, %v4312_v6 }
 0x3e3   : > { %3099 = vmatpush.msk.msra.mxu0 %vm478_vm0, %v2147_v63  ;;  %3116 = vmatpush.msk.msra.mxu1 %vm478_vm0, %v2148_v31 }
 0x3e6   : > { %3102 = vmatmul.msk.f32.gmra.mxu2 %vm429_vm1, %v4334_v45  ;;  %3119 = vmatmul.msk.f32.gmra.mxu3 %vm429_vm1, %v4334_v45 }
 0x3e7   : > { %v1766_v37 = vpop.f32.mrf.mxu2 }
 0x3e8   : > { %2979 = vst [vmem:[%s3939_s6 + $0x550] sm:$0xff] %v1766_v37 }
 0x3ea   : > { %3035 = vmatmul.msk.f32.gmra.mxu0 %vm429_vm1, %v4323_v28  ;;  %3052 = vmatmul.msk.f32.gmra.mxu1 %vm429_vm1, %v4323_v28  ;;  %v1831_v28 = vpop.f32.mrf.mxu3 }
 0x3eb   : > { %2980 = vst [vmem:[%s3939_s6 + $0x558] sm:$0xff] %v1831_v28 }
 0x3ee   : > { %3103 = vmatmul.msk.f32.gmra.mxu2 %vm429_vm1, %v4345_v32  ;;  %3120 = vmatmul.msk.f32.gmra.mxu3 %vm429_vm1, %v4345_v32 }
 0x3ef   : > { %v1769_v38 = vpop.f32.mrf.mxu2 }
 0x3f0   : > { %2981 = vst [vmem:[%s3939_s6 + $0x560] sm:$0xff] %v1769_v38 }
 0x3f2   : > { %3036 = vmatmul.msk.f32.gmra.mxu0 %vm429_vm1, %v4334_v45  ;;  %3053 = vmatmul.msk.f32.gmra.mxu1 %vm429_vm1, %v4334_v45  ;;  %v1834_v45 = vpop.f32.mrf.mxu3 }
 0x3f3   : > { %2982 = vst [vmem:[%s3939_s6 + $0x568] sm:$0xff] %v1834_v45 }
 0x3f6   : > { %3104 = vmatmul.msk.f32.gmra.mxu2 %vm429_vm1, %v4356_v34  ;;  %3121 = vmatmul.msk.f32.gmra.mxu3 %vm429_vm1, %v4356_v34 }
 0x3f7   : > { %v1772_v39 = vpop.f32.mrf.mxu2 }
 0x3f8   : > { %2983 = vst [vmem:[%s3939_s6 + $0x570] sm:$0xff] %v1772_v39 }
 0x3fa   : > { %3037 = vmatmul.msk.f32.gmra.mxu0 %vm429_vm1, %v4345_v32  ;;  %3054 = vmatmul.msk.f32.gmra.mxu1 %vm429_vm1, %v4345_v32  ;;  %v1837_v32 = vpop.f32.mrf.mxu3 }
 0x3fb   : > { %2984 = vst [vmem:[%s3939_s6 + $0x578] sm:$0xff] %v1837_v32 }
 0x3fe   : > { %3105 = vmatmul.msk.f32.gmra.mxu2 %vm429_vm1, %v4373_v44  ;;  %3122 = vmatmul.msk.f32.gmra.mxu3 %vm429_vm1, %v4373_v44 }
 0x3ff   : > { %v1775_v40 = vpop.f32.mrf.mxu2 }
 0x400   : > { %2985 = vst [vmem:[%s3939_s6 + $0x580] sm:$0xff] %v1775_v40 }
 0x402   : > { %3038 = vmatmul.msk.f32.gmra.mxu0 %vm429_vm1, %v4356_v34  ;;  %3055 = vmatmul.msk.f32.gmra.mxu1 %vm429_vm1, %v4356_v34  ;;  %v1840_v34 = vpop.f32.mrf.mxu3 }
 0x403   : > { %2986 = vst [vmem:[%s3939_s6 + $0x588] sm:$0xff] %v1840_v34 }
 0x406   : > { %3106 = vmatmul.msk.f32.gmra.mxu2 %vm429_vm1, %v4388_v60  ;;  %3123 = vmatmul.msk.f32.gmra.mxu3 %vm429_vm1, %v4388_v60 }
 0x407   : > { %v1778_v2 = vpop.f32.mrf.mxu2 }
 0x408   : > { %2987 = vst [vmem:[%s3939_s6 + $0x590] sm:$0xff] %v1778_v2 }
 0x40a   : > { %3039 = vmatmul.msk.f32.gmra.mxu0 %vm429_vm1, %v4373_v44  ;;  %3056 = vmatmul.msk.f32.gmra.mxu1 %vm429_vm1, %v4373_v44  ;;  %v1843_v44 = vpop.f32.mrf.mxu3 }
 0x40b   : > { %2988 = vst [vmem:[%s3939_s6 + $0x598] sm:$0xff] %v1843_v44 }
 0x40e   : > { %3107 = vmatmul.msk.f32.gmra.mxu2 %vm429_vm1, %v4401_v46  ;;  %3124 = vmatmul.msk.f32.gmra.mxu3 %vm429_vm1, %v4401_v46 }
 0x40f   : > { %v1781_v41 = vpop.f32.mrf.mxu2 }
 0x410   : > { %2989 = vst [vmem:[%s3939_s6 + $0x5a0] sm:$0xff] %v1781_v41 }
 0x412   : > { %3040 = vmatmul.msk.f32.gmra.mxu0 %vm429_vm1, %v4388_v60  ;;  %3057 = vmatmul.msk.f32.gmra.mxu1 %vm429_vm1, %v4388_v60  ;;  %v1846_v60 = vpop.f32.mrf.mxu3 }
 0x413   : > { %2990 = vst [vmem:[%s3939_s6 + $0x5a8] sm:$0xff] %v1846_v60 }
 0x416   : > { %3108 = vmatmul.msk.f32.gmra.mxu2 %vm429_vm1, %v4414_v47  ;;  %3125 = vmatmul.msk.f32.gmra.mxu3 %vm429_vm1, %v4414_v47 }
 0x417   : > { %v1784_v42 = vpop.f32.mrf.mxu2 }
 0x418   : > { %2991 = vst [vmem:[%s3939_s6 + $0x5b0] sm:$0xff] %v1784_v42 }
 0x41a   : > { %3041 = vmatmul.msk.f32.gmra.mxu0 %vm429_vm1, %v4401_v46  ;;  %3058 = vmatmul.msk.f32.gmra.mxu1 %vm429_vm1, %v4401_v46  ;;  %v1849_v46 = vpop.f32.mrf.mxu3 }
 0x41b   : > { %2992 = vst [vmem:[%s3939_s6 + $0x5b8] sm:$0xff] %v1849_v46 }
 0x41e   : > { %3109 = vmatmul.msk.f32.gmra.mxu2 %vm429_vm1, %v4435_v59  ;;  %3126 = vmatmul.msk.f32.gmra.mxu3 %vm429_vm1, %v4435_v59 }
 0x41f   : > { %v1787_v52 = vpop.f32.mrf.mxu2 }
 0x420   : > { %2993 = vst [vmem:[%s3939_s6 + $0x5c0] sm:$0xff] %v1787_v52 }
 0x422   : > { %3042 = vmatmul.msk.f32.gmra.mxu0 %vm429_vm1, %v4414_v47  ;;  %3059 = vmatmul.msk.f32.gmra.mxu1 %vm429_vm1, %v4414_v47  ;;  %v1852_v47 = vpop.f32.mrf.mxu3 }
 0x423   : > { %2994 = vst [vmem:[%s3939_s6 + $0x5c8] sm:$0xff] %v1852_v47 }
 0x426   : > { %3110 = vmatmul.msk.f32.gmra.mxu2 %vm429_vm1, %v4456_v13  ;;  %3127 = vmatmul.msk.f32.gmra.mxu3 %vm429_vm1, %v4456_v13 }
 0x427   : > { %v1790_v3 = vpop.f32.mrf.mxu2 }
 0x428   : > { %2995 = vst [vmem:[%s3939_s6 + $0x5d0] sm:$0xff] %v1790_v3 }
 0x42a   : > { %3043 = vmatmul.msk.f32.gmra.mxu0 %vm429_vm1, %v4435_v59  ;;  %3060 = vmatmul.msk.f32.gmra.mxu1 %vm429_vm1, %v4435_v59  ;;  %v1855_v59 = vpop.f32.mrf.mxu3 }
 0x42b   : > { %2996 = vst [vmem:[%s3939_s6 + $0x5d8] sm:$0xff] %v1855_v59 }
 0x42e   : > { %3111 = vmatmul.msk.f32.gmra.mxu2 %vm429_vm1, %v4477_v19  ;;  %3128 = vmatmul.msk.f32.gmra.mxu3 %vm429_vm1, %v4477_v19 }
 0x42f   : > { %v1793_v55 = vpop.f32.mrf.mxu2 }
 0x430   : > { %2997 = vst [vmem:[%s3939_s6 + $0x5e0] sm:$0xff] %v1793_v55 }
 0x432   : > { %3044 = vmatmul.msk.f32.gmra.mxu0 %vm429_vm1, %v4456_v13  ;;  %3061 = vmatmul.msk.f32.gmra.mxu1 %vm429_vm1, %v4456_v13  ;;  %v1858_v13 = vpop.f32.mrf.mxu3 }
 0x433   : > { %2998 = vst [vmem:[%s3939_s6 + $0x5e8] sm:$0xff] %v1858_v13 }
 0x436   : > { %3112 = vmatmul.msk.f32.gmra.mxu2 %vm429_vm1, %v4498_v7  ;;  %3129 = vmatmul.msk.f32.gmra.mxu3 %vm429_vm1, %v4498_v7 }
 0x437   : > { %v1796_v56 = vpop.f32.mrf.mxu2 }
 0x438   : > { %2999 = vst [vmem:[%s3939_s6 + $0x5f0] sm:$0xff] %v1796_v56 }
 0x43a   : > { %3045 = vmatmul.msk.f32.gmra.mxu0 %vm429_vm1, %v4477_v19  ;;  %3062 = vmatmul.msk.f32.gmra.mxu1 %vm429_vm1, %v4477_v19  ;;  %v1861_v57 = vpop.f32.mrf.mxu3 }
 0x43b   : > { %3000 = vst [vmem:[%s3939_s6 + $0x5f8] sm:$0xff] %v1861_v57 }
 0x43e   : > { %3113 = vmatmul.msk.f32.gmra.mxu2 %vm429_vm1, %v4511_v27  ;;  %3130 = vmatmul.msk.f32.gmra.mxu3 %vm429_vm1, %v4511_v27 }
 0x442   : > { %3046 = vmatmul.msk.f32.gmra.mxu0 %vm429_vm1, %v4498_v7  ;;  %3063 = vmatmul.msk.f32.gmra.mxu1 %vm429_vm1, %v4498_v7 }
 0x446   : > { %3114 = vmatmul.msk.f32.gmra.mxu2 %vm429_vm1, %v4524_v29  ;;  %3131 = vmatmul.msk.f32.gmra.mxu3 %vm429_vm1, %v4524_v29 }
 0x44a   : > { %3047 = vmatmul.msk.f32.gmra.mxu0 %vm429_vm1, %v4511_v27  ;;  %3064 = vmatmul.msk.f32.gmra.mxu1 %vm429_vm1, %v4511_v27 }
 0x44e   : > { %3115 = vmatmul.msk.f32.gmra.mxu2 %vm429_vm1, %v4537_v0  ;;  %3132 = vmatmul.msk.f32.gmra.mxu3 %vm429_vm1, %v4537_v0 }
 0x452   : > { %3048 = vmatmul.msk.f32.gmra.mxu0 %vm429_vm1, %v4524_v29  ;;  %3065 = vmatmul.msk.f32.gmra.mxu1 %vm429_vm1, %v4524_v29 }
 0x45a   : > { %3049 = vmatmul.msk.f32.gmra.mxu0 %vm429_vm1, %v4537_v0  ;;  %3066 = vmatmul.msk.f32.gmra.mxu1 %vm429_vm1, %v4537_v0 }
 0x45f   : > { %v2001_v19 = vpop.f32.mrf.mxu0  ;;  %v2066_v7 = vpop.f32.mrf.mxu1 }
 0x460   : > { %3067 = vst [vmem:[%s3939_s6 + $0x600] sm:$0xff] %v2001_v19 }
 0x461   : > { %v2175_v27 = vpop.f32.mrf.mxu2  ;;  %v2240_v53 = vpop.f32.mrf.mxu3  ;;  %3068 = vst [vmem:[%s3939_s6 + $0x608] sm:$0xff] %v2066_v7 }
 0x462   : > { %3100 = vmatmul.msk.f32.vlgmr.msra.gmra.mxu0 %vm429_vm1, %v4312_v6  ;;  %3117 = vmatmul.msk.f32.vlgmr.msra.gmra.mxu1 %vm429_vm1, %v4312_v6  ;;  %3135 = vst [vmem:[%s3939_s6 + $0x710] sm:$0xff] %v2175_v27 }
 0x463   : > { %3136 = vst [vmem:[%s3939_s6 + $0x718] sm:$0xff] %v2240_v53 }
 0x467   : > { %v2004_v29 = vpop.f32.mrf.mxu0  ;;  %v2069_v0 = vpop.f32.mrf.mxu1 }
 0x468   : > { %3069 = vst [vmem:[%s3939_s6 + $0x610] sm:$0xff] %v2004_v29 }
 0x469   : > { %v2178_v54 = vpop.f32.mrf.mxu2  ;;  %v2243_v58 = vpop.f32.mrf.mxu3  ;;  %3070 = vst [vmem:[%s3939_s6 + $0x618] sm:$0xff] %v2069_v0 }
 0x46a   : > { %3137 = vst [vmem:[%s3939_s6 + $0x720] sm:$0xff] %v2178_v54 }
 0x46b   : > { %3138 = vst [vmem:[%s3939_s6 + $0x728] sm:$0xff] %v2243_v58 }
 0x46f   : > { %v2007_v10 = vpop.f32.mrf.mxu0  ;;  %v2072_v62 = vpop.f32.mrf.mxu1 }
 0x470   : > { %3071 = vst [vmem:[%s3939_s6 + $0x620] sm:$0xff] %v2007_v10 }
 0x471   : > { %v2181_v6 = vpop.f32.mrf.mxu2  ;;  %v2246_v4 = vpop.f32.mrf.mxu3  ;;  %3072 = vst [vmem:[%s3939_s6 + $0x628] sm:$0xff] %v2072_v62 }
 0x472   : > { %3139 = vst [vmem:[%s3939_s6 + $0x730] sm:$0xff] %v2181_v6 }
 0x473   : > { %3140 = vst [vmem:[%s3939_s6 + $0x738] sm:$0xff] %v2246_v4 }
 0x477   : > { %v2010_v5 = vpop.f32.mrf.mxu0  ;;  %v2075_v8 = vpop.f32.mrf.mxu1 }
 0x478   : > { %3073 = vst [vmem:[%s3939_s6 + $0x630] sm:$0xff] %v2010_v5 }
 0x479   : > { %v2184_v11 = vpop.f32.mrf.mxu2  ;;  %v2249_v17 = vpop.f32.mrf.mxu3  ;;  %3074 = vst [vmem:[%s3939_s6 + $0x638] sm:$0xff] %v2075_v8 }
 0x47a   : > { %3141 = vst [vmem:[%s3939_s6 + $0x740] sm:$0xff] %v2184_v11 }
 0x47b   : > { %3142 = vst [vmem:[%s3939_s6 + $0x748] sm:$0xff] %v2249_v17 }
 0x47f   : > { %v2013_v12 = vpop.f32.mrf.mxu0  ;;  %v2078_v14 = vpop.f32.mrf.mxu1 }
 0x480   : > { %3075 = vst [vmem:[%s3939_s6 + $0x640] sm:$0xff] %v2013_v12 }
 0x481   : > { %v2187_v15 = vpop.f32.mrf.mxu2  ;;  %v2252_v16 = vpop.f32.mrf.mxu3  ;;  %3076 = vst [vmem:[%s3939_s6 + $0x648] sm:$0xff] %v2078_v14 }
 0x482   : > { %3143 = vst [vmem:[%s3939_s6 + $0x750] sm:$0xff] %v2187_v15 }
 0x483   : > { %3144 = vst [vmem:[%s3939_s6 + $0x758] sm:$0xff] %v2252_v16 }
 0x487   : > { %v2016_v49 = vpop.f32.mrf.mxu0  ;;  %v2081_v50 = vpop.f32.mrf.mxu1 }
 0x488   : > { %3077 = vst [vmem:[%s3939_s6 + $0x650] sm:$0xff] %v2016_v49 }
 0x489   : > { %v2190_v24 = vpop.f32.mrf.mxu2  ;;  %v2255_v18 = vpop.f32.mrf.mxu3  ;;  %3078 = vst [vmem:[%s3939_s6 + $0x658] sm:$0xff] %v2081_v50 }
 0x48a   : > { %3145 = vst [vmem:[%s3939_s6 + $0x760] sm:$0xff] %v2190_v24 }
 0x48b   : > { %3146 = vst [vmem:[%s3939_s6 + $0x768] sm:$0xff] %v2255_v18 }
 0x48f   : > { %v2019_v51 = vpop.f32.mrf.mxu0  ;;  %v2084_v20 = vpop.f32.mrf.mxu1 }
 0x490   : > { %3079 = vst [vmem:[%s3939_s6 + $0x660] sm:$0xff] %v2019_v51 }
 0x491   : > { %v2193_v21 = vpop.f32.mrf.mxu2  ;;  %v2258_v22 = vpop.f32.mrf.mxu3  ;;  %3080 = vst [vmem:[%s3939_s6 + $0x668] sm:$0xff] %v2084_v20 }
 0x492   : > { %3147 = vst [vmem:[%s3939_s6 + $0x770] sm:$0xff] %v2193_v21 }
 0x493   : > { %3148 = vst [vmem:[%s3939_s6 + $0x778] sm:$0xff] %v2258_v22 }
 0x497   : > { %v2022_v23 = vpop.f32.mrf.mxu0  ;;  %v2087_v63 = vpop.f32.mrf.mxu1 }
 0x498   : > { %3081 = vst [vmem:[%s3939_s6 + $0x670] sm:$0xff] %v2022_v23 }
 0x499   : > { %v2196_v25 = vpop.f32.mrf.mxu2  ;;  %v2261_v31 = vpop.f32.mrf.mxu3  ;;  %3082 = vst [vmem:[%s3939_s6 + $0x678] sm:$0xff] %v2087_v63 }
 0x49a   : > { %3149 = vst [vmem:[%s3939_s6 + $0x780] sm:$0xff] %v2196_v25 }
 0x49b   : > { %3150 = vst [vmem:[%s3939_s6 + $0x788] sm:$0xff] %v2261_v31 }
 0x49f   : > { %v2025_v26 = vpop.f32.mrf.mxu0  ;;  %v2090_v30 = vpop.f32.mrf.mxu1 }
 0x4a0   : > { %3083 = vst [vmem:[%s3939_s6 + $0x680] sm:$0xff] %v2025_v26 }
 0x4a1   : > { %v2199_v61 = vpop.f32.mrf.mxu2  ;;  %v2264_v9 = vpop.f32.mrf.mxu3  ;;  %3084 = vst [vmem:[%s3939_s6 + $0x688] sm:$0xff] %v2090_v30 }
 0x4a2   : > { %3151 = vst [vmem:[%s3939_s6 + $0x790] sm:$0xff] %v2199_v61 }
 0x4a3   : > { %3152 = vst [vmem:[%s3939_s6 + $0x798] sm:$0xff] %v2264_v9 }
 0x4a7   : > { %v2028_v1 = vpop.f32.mrf.mxu0  ;;  %v2093_v36 = vpop.f32.mrf.mxu1 }
 0x4a8   : > { %3085 = vst [vmem:[%s3939_s6 + $0x690] sm:$0xff] %v2028_v1 }
 0x4a9   : > { %v2202_v33 = vpop.f32.mrf.mxu2  ;;  %v2267_v48 = vpop.f32.mrf.mxu3  ;;  %3086 = vst [vmem:[%s3939_s6 + $0x698] sm:$0xff] %v2093_v36 }
 0x4aa   : > { %3153 = vst [vmem:[%s3939_s6 + $0x7a0] sm:$0xff] %v2202_v33 }
 0x4ab   : > { %3154 = vst [vmem:[%s3939_s6 + $0x7a8] sm:$0xff] %v2267_v48 }
 0x4af   : > { %v2031_v43 = vpop.f32.mrf.mxu0  ;;  %v2096_v35 = vpop.f32.mrf.mxu1 }
 0x4b0   : > { %3087 = vst [vmem:[%s3939_s6 + $0x6a0] sm:$0xff] %v2031_v43 }
 0x4b1   : > { %v2205_v37 = vpop.f32.mrf.mxu2  ;;  %v2270_v28 = vpop.f32.mrf.mxu3  ;;  %3088 = vst [vmem:[%s3939_s6 + $0x6a8] sm:$0xff] %v2096_v35 }
 0x4b2   : > { %3155 = vst [vmem:[%s3939_s6 + $0x7b0] sm:$0xff] %v2205_v37 }
 0x4b3   : > { %3156 = vst [vmem:[%s3939_s6 + $0x7b8] sm:$0xff] %v2270_v28 }
 0x4b7   : > { %v2034_v38 = vpop.f32.mrf.mxu0  ;;  %v2099_v45 = vpop.f32.mrf.mxu1 }
 0x4b8   : > { %3089 = vst [vmem:[%s3939_s6 + $0x6b0] sm:$0xff] %v2034_v38 }
 0x4b9   : > { %v2208_v39 = vpop.f32.mrf.mxu2  ;;  %v2273_v32 = vpop.f32.mrf.mxu3  ;;  %3090 = vst [vmem:[%s3939_s6 + $0x6b8] sm:$0xff] %v2099_v45 }
 0x4ba   : > { %3157 = vst [vmem:[%s3939_s6 + $0x7c0] sm:$0xff] %v2208_v39 }
 0x4bb   : > { %3158 = vst [vmem:[%s3939_s6 + $0x7c8] sm:$0xff] %v2273_v32 }
 0x4bf   : > { %v2037_v40 = vpop.f32.mrf.mxu0  ;;  %v2102_v34 = vpop.f32.mrf.mxu1 }
 0x4c0   : > { %3091 = vst [vmem:[%s3939_s6 + $0x6c0] sm:$0xff] %v2037_v40 }
 0x4c1   : > { %v2211_v2 = vpop.f32.mrf.mxu2  ;;  %v2276_v44 = vpop.f32.mrf.mxu3  ;;  %3092 = vst [vmem:[%s3939_s6 + $0x6c8] sm:$0xff] %v2102_v34 }
 0x4c2   : > { %3159 = vst [vmem:[%s3939_s6 + $0x7d0] sm:$0xff] %v2211_v2 }
 0x4c3   : > { %3160 = vst [vmem:[%s3939_s6 + $0x7d8] sm:$0xff] %v2276_v44 }
 0x4c7   : > { %v2040_v41 = vpop.f32.mrf.mxu0  ;;  %v2105_v60 = vpop.f32.mrf.mxu1 }
 0x4c8   : > { %3093 = vst [vmem:[%s3939_s6 + $0x6d0] sm:$0xff] %v2040_v41 }
 0x4c9   : > { %v2214_v42 = vpop.f32.mrf.mxu2  ;;  %v2279_v46 = vpop.f32.mrf.mxu3  ;;  %3094 = vst [vmem:[%s3939_s6 + $0x6d8] sm:$0xff] %v2105_v60 }
 0x4ca   : > { %3161 = vst [vmem:[%s3939_s6 + $0x7e0] sm:$0xff] %v2214_v42 }
 0x4cb   : > { %3162 = vst [vmem:[%s3939_s6 + $0x7e8] sm:$0xff] %v2279_v46 }
 0x4cf   : > { %v2043_v52 = vpop.f32.mrf.mxu0  ;;  %v2108_v47 = vpop.f32.mrf.mxu1 }
 0x4d0   : > { %3095 = vst [vmem:[%s3939_s6 + $0x6e0] sm:$0xff] %v2043_v52 }
 0x4d1   : > { %v2217_v3 = vpop.f32.mrf.mxu2  ;;  %v2282_v59 = vpop.f32.mrf.mxu3  ;;  %3096 = vst [vmem:[%s3939_s6 + $0x6e8] sm:$0xff] %v2108_v47 }
 0x4d2   : > { %3163 = vst [vmem:[%s3939_s6 + $0x7f0] sm:$0xff] %v2217_v3 }
 0x4d3   : > { %3164 = vst [vmem:[%s3939_s6 + $0x7f8] sm:$0xff] %v2282_v59 }
 0x4d7   : > { %v2046_v55 = vpop.f32.mrf.mxu0  ;;  %v2111_v13 = vpop.f32.mrf.mxu1 }
 0x4d8   : > { %3097 = vst [vmem:[%s3939_s6 + $0x6f0] sm:$0xff] %v2046_v55 }
 0x4d9   : > { %3098 = vst [vmem:[%s3939_s6 + $0x6f8] sm:$0xff] %v2111_v13 }
 0x4df   : > { %v2172_v56 = vpop.f32.mrf.mxu0  ;;  %v2237_v57 = vpop.f32.mrf.mxu1 }
 0x4e0   : > { %3133 = vst [vmem:[%s3939_s6 + $0x700] sm:$0xff] %v2172_v56 }
 0x4e1   : > { %3134 = vst [vmem:[%s3939_s6 + $0x708] sm:$0xff] %v2237_v57 }
 0x4e2   : > { %3357 = shalt.err (!%p3354_p1)
}
 0x4e3   : > { %s3422_s13 = smov 256   ;;  %s3423_s6 = smov 16  }
 0x4e4   : > { %3180 = dma.vmem_to_hbm [thread:$0]  (%p3501_p8), %s2334_s25, 32768, %s2336_s29, %s2319_s30, %s3422_s13, %s3422_s13, %s3423_s6  }
 0x4e5 PF: > { %s4893_s24 = sld [smem:[#allocation11_spill]]  ;;  %s2350_s26 = sand.u32 1, %s3396_s15  }
 0x4e6   : > { %p3191_p2 = pnand %p2437_p13, %p3505_p9  ;;  %s2351_s23 = scalar_lea.sflag [#allocation4], %s2350_s26 }
 0x4e8   : > { %p3192_p4 = pneg %p3191_p2 }
 0x4ea   : > { %3391 = dma.done.wait (%p3192_p4), %s2351_s23, 32768  }
 0x4eb   : > { %3393 = vsyncadd (%p3192_p4), %s2351_s23, 4294934528  ;;  %s21_s20 = sadd.s32 1, %s4893_s24   ;;  %s4894_s15 = smov %s3400_s16 }
 0x4ec   : > { %p18_p6 = scmp.ge.s32.totalorder %s21_s20, 4   ;;  %s4895_s16 = smov %s3404_s17 }
 0x4ed   : > { %s4896_s17 = smov %s3543_s7  ;;  %s4897_s18 = smov %s3412_s19 }
 0x4ee   : > { %s4898_s19 = smov %s4900_s10  ;;  %20 = sbr.rel (!%p18_p6) target bundleno = 9 (0x9), region = 99 }
 0x4f3   :  { %2357 = vsyncpa [#allocation3], 1 }
 0x4f4   :  { %2359 = vsyncpa [#allocation3 + $0x1], 1 }
 0x4f5   :  { %2360 = vsyncpa [#allocation6], 1 }
 0x4f6   :  { %2361 = vsyncpa [#allocation4], 1 }
 0x4f7   :  { %2363 = vsyncpa [#allocation4 + $0x1], 1 }

</bundles_post_ra>
